<compile_context>
chip_gen: v5e
topology: v5e:2x2
jax: 0.10.0
libtpu: 0.0.40
codegen_flags: <defaults>
</compile_context>

<pallas_src>
import functools

import jax
import jax.numpy as jnp
from jax.experimental import pallas as pl
from jax.experimental.pallas import tpu as pltpu

IN_FEATURES = 28 * 28        # 784 (full last dim of x -> no lane-pad needed)
H1, H2 = 512, 256
OUT = 10
OUT_PAD = 128                # lane-dense padded logits width
NEG_INF = -1e30


def _round_up(n, m):
    return ((n + m - 1) // m) * m


def mlp_kernel(x_ref, w1_ref, b1_ref, w2_ref, b2_ref, w3_ref, b3_ref, o_ref):
    # fc1: bf16 inputs, f32 accumulation on the MXU; activations kept in f32.
    z1 = jnp.dot(x_ref[...], w1_ref[...],
                 preferred_element_type=jnp.float32) + b1_ref[...]
    h1 = 0.5 * jnp.tanh(0.5 * z1) + 0.5        # sigmoid: single EUP tanh push per vreg
    # fc2
    z2 = jnp.dot(h1.astype(jnp.bfloat16), w2_ref[...],
                 preferred_element_type=jnp.float32) + b2_ref[...]
    h2 = 0.5 * jnp.tanh(0.5 * z2) + 0.5
    # fc3 (output padded to 128 lanes; padded lanes carry bias NEG_INF so they never
    # win the max and contribute ~0 to the softmax denominator).
    logits = jnp.dot(h2.astype(jnp.bfloat16), w3_ref[...],
                     preferred_element_type=jnp.float32) + b3_ref[...]
    # log_softmax over the last axis (f32, numerically stable); store bf16.
    m = jnp.max(logits, axis=-1, keepdims=True)
    shifted = logits - m
    lse = jnp.log(jnp.sum(jnp.exp(shifted), axis=-1, keepdims=True))
    o_ref[...] = (shifted - lse).astype(o_ref.dtype)


def pack_params(w1, b1, w2, b2, w3, b3):
    """Cast/pad the (in, out)-layout params into the kernel layout."""
    w1p = w1.astype(jnp.bfloat16)                                       # (784, 512), no K pad
    w2p = w2.astype(jnp.bfloat16)                                       # (512, 256)
    w3p = (jnp.zeros((H2, OUT_PAD), jnp.float32)
           .at[:, :OUT].set(w3)).astype(jnp.bfloat16)                   # lane-padded with zeros
    b1p = b1.reshape(1, H1).astype(jnp.float32)
    b2p = b2.reshape(1, H2).astype(jnp.float32)
    b3p = (jnp.full((1, OUT_PAD), NEG_INF, jnp.float32)
           .at[0, :OUT].set(b3.reshape(-1)))                            # padded lanes -> -1e30
    return w1p, b1p, w2p, b2p, w3p, b3p


@functools.partial(jax.jit, static_argnames=("tm",))
def mlp_forward(x, w1p, b1p, w2p, b2p, w3p, b3p, *, tm=512):
    # tm only streams rows through the MXU (K/N fill the array on every TPU gen), so a
    # large tm just amortizes per-grid-step overhead.  Weights are VMEM-resident.
    B = x.shape[0]
    b8 = _round_up(B, 8)                      # sublane-rounded batch
    tm_eff = min(tm, b8)
    # Prefer >= 2 batch tiles (when the batch permits) so ("parallel",) shards the grid
    # across v7x's two TensorCores; a no-op on single-TC v5e/v6e.
    if b8 > 8 and -(-b8 // tm_eff) < 2:
        tm_eff = _round_up(-(-b8 // 2), 8)
    n_tiles = -(-b8 // tm_eff)
    bp = n_tiles * tm_eff

    # Single down-cast pass + batch-only pad (no f32 scatter-copy of the whole batch).
    xb = x.reshape(B, IN_FEATURES).astype(jnp.bfloat16)
    xp = jnp.pad(xb, ((0, bp - B), (0, 0)))

    const = lambda i: (0, 0)  # weights/biases: same block every grid step -> stay resident
    out = pl.pallas_call(
        mlp_kernel,
        out_shape=jax.ShapeDtypeStruct((bp, OUT_PAD), jnp.bfloat16),
        grid=(n_tiles,),
        in_specs=[
            pl.BlockSpec((tm_eff, IN_FEATURES), lambda i: (i, 0)),  # x tile, double-buffered
            pl.BlockSpec((IN_FEATURES, H1), const),
            pl.BlockSpec((1, H1), const),
            pl.BlockSpec((H1, H2), const),
            pl.BlockSpec((1, H2), const),
            pl.BlockSpec((H2, OUT_PAD), const),
            pl.BlockSpec((1, OUT_PAD), const),
        ],
        out_specs=pl.BlockSpec((tm_eff, OUT_PAD), lambda i: (i, 0)),
        compiler_params=pltpu.CompilerParams(
            dimension_semantics=("parallel",)),             # shards batch tiles on v7x megacore
    )(xp, w1p, b1p, w2p, b2p, w3p, b3p)
    # Drop batch padding and the 118 padded logit lanes.
    return out[:B, :OUT]


def init_params(key):
    """Deterministic PyTorch-like init: U(-1/sqrt(fan_in), 1/sqrt(fan_in))."""
    dims = [(IN_FEATURES, H1), (H1, H2), (H2, OUT)]
    params = []
    for fan_in, fan_out in dims:
        kw, kb, key = jax.random.split(key, 3)
        bound = 1.0 / jnp.sqrt(float(fan_in))
        w = jax.random.uniform(kw, (fan_in, fan_out), jnp.float32, -bound, bound)
        b = jax.random.uniform(kb, (1, fan_out), jnp.float32, -bound, bound)
        params += [w, b]
    return params


def reference_forward(x, w1, b1, w2, b2, w3, b3):
    """Pure-JAX f32 reference matching the PyTorch module semantics."""
    B = x.shape[0]
    h = x.reshape(B, IN_FEATURES).astype(jnp.float32)
    h = jax.nn.sigmoid(h @ w1 + b1)
    h = jax.nn.sigmoid(h @ w2 + b2)
    logits = h @ w3 + b3
    return jax.nn.log_softmax(logits, axis=1)


if __name__ == "__main__":
    key = jax.random.PRNGKey(0)
    kx, kp = jax.random.split(key)
    # Small batch of MNIST-shaped inputs (NCHW, like PyTorch).
    x = jax.random.normal(kx, (8, 1, 28, 28), jnp.float32)
    params = init_params(kp)
    packed = pack_params(*params)

    out = mlp_forward(x, *packed)
    out = jax.block_until_ready(out)

    ref = reference_forward(x, *params)
    assert out.shape == (8, 10)
    # Loose tolerance: kernel uses bf16 matmul inputs and a bf16 output store,
    # reference is full f32.
    assert jnp.allclose(out.astype(jnp.float32), ref, atol=5e-2, rtol=5e-2), \
        "mismatch vs JAX reference"
    print("KERNEL_OK")
</pallas_src>

<mosaic_0001>
module attributes {stable_mosaic.version = 11 : i64} {
  func.func @mlp_kernel(%arg0: i32, %arg1: memref<8x784xbf16, #tpu.memory_space<vmem>>, %arg2: memref<784x512xbf16, #tpu.memory_space<vmem>>, %arg3: memref<1x512xf32, #tpu.memory_space<vmem>>, %arg4: memref<512x256xbf16, #tpu.memory_space<vmem>>, %arg5: memref<1x256xf32, #tpu.memory_space<vmem>>, %arg6: memref<256x128xbf16, #tpu.memory_space<vmem>>, %arg7: memref<1x128xf32, #tpu.memory_space<vmem>>, %arg8: memref<8x128xbf16, #tpu.memory_space<vmem>>) attributes {dimension_semantics = [#tpu.dimension_semantics<parallel>], iteration_bounds = array<i64: 1>, scalar_prefetch = 0 : i64, scratch_operands = 0 : i64, tpu.core_type = #tpu.core_type<tc>, window_params = [{transform_indices = @transform_0, window_bounds = array<i64: 8, 784>}, {pipeline_mode = #tpu.pipeline_mode<synchronous>, transform_indices = @transform_1, window_bounds = array<i64: 784, 512>}, {pipeline_mode = #tpu.pipeline_mode<synchronous>, transform_indices = @transform_2, window_bounds = array<i64: 1, 512>}, {pipeline_mode = #tpu.pipeline_mode<synchronous>, transform_indices = @transform_3, window_bounds = array<i64: 512, 256>}, {pipeline_mode = #tpu.pipeline_mode<synchronous>, transform_indices = @transform_4, window_bounds = array<i64: 1, 256>}, {pipeline_mode = #tpu.pipeline_mode<synchronous>, transform_indices = @transform_5, window_bounds = array<i64: 256, 128>}, {pipeline_mode = #tpu.pipeline_mode<synchronous>, transform_indices = @transform_6, window_bounds = array<i64: 1, 128>}, {transform_indices = @transform_7, window_bounds = array<i64: 8, 128>}]} {
    %c0 = arith.constant 0 : index
    %c0_0 = arith.constant 0 : index
    %0 = vector.load %arg1[%c0, %c0_0] : memref<8x784xbf16, #tpu.memory_space<vmem>>, vector<8x784xbf16>
    %c0_1 = arith.constant 0 : index
    %c0_2 = arith.constant 0 : index
    %1 = vector.load %arg2[%c0_1, %c0_2] : memref<784x512xbf16, #tpu.memory_space<vmem>>, vector<784x512xbf16>
    %cst = arith.constant dense<0.000000e+00> : vector<8x512xf32>
    %2 = tpu.matmul %0, %1, %cst {dimension_numbers = #tpu.dot_dimension_numbers<[1], [0], [0], [1], [0, 0, 1, 1], [], []>} : vector<8x784xbf16>, vector<784x512xbf16>, vector<8x512xf32> -> vector<8x512xf32>
    %c0_3 = arith.constant 0 : index
    %c0_4 = arith.constant 0 : index
    %3 = vector.load %arg3[%c0_3, %c0_4] : memref<1x512xf32, #tpu.memory_space<vmem>>, vector<1x512xf32>
    %4 = vector.broadcast %3 : vector<1x512xf32> to vector<8x512xf32>
    %5 = arith.addf %2, %4 : vector<8x512xf32>
    %cst_5 = arith.constant 5.000000e-01 : f32
    %6 = vector.broadcast %cst_5 : f32 to vector<8x512xf32>
    %7 = arith.mulf %6, %5 : vector<8x512xf32>
    %8 = math.tanh %7 : vector<8x512xf32>
    %cst_6 = arith.constant 5.000000e-01 : f32
    %9 = vector.broadcast %cst_6 : f32 to vector<8x512xf32>
    %10 = arith.mulf %9, %8 : vector<8x512xf32>
    %cst_7 = arith.constant 5.000000e-01 : f32
    %11 = vector.broadcast %cst_7 : f32 to vector<8x512xf32>
    %12 = arith.addf %10, %11 : vector<8x512xf32>
    %13 = arith.truncf %12 : vector<8x512xf32> to vector<8x512xbf16>
    %c0_8 = arith.constant 0 : index
    %c0_9 = arith.constant 0 : index
    %14 = vector.load %arg4[%c0_8, %c0_9] : memref<512x256xbf16, #tpu.memory_space<vmem>>, vector<512x256xbf16>
    %cst_10 = arith.constant dense<0.000000e+00> : vector<8x256xf32>
    %15 = tpu.matmul %13, %14, %cst_10 {dimension_numbers = #tpu.dot_dimension_numbers<[1], [0], [0], [1], [0, 0, 1, 1], [], []>} : vector<8x512xbf16>, vector<512x256xbf16>, vector<8x256xf32> -> vector<8x256xf32>
    %c0_11 = arith.constant 0 : index
    %c0_12 = arith.constant 0 : index
    %16 = vector.load %arg5[%c0_11, %c0_12] : memref<1x256xf32, #tpu.memory_space<vmem>>, vector<1x256xf32>
    %17 = vector.broadcast %16 : vector<1x256xf32> to vector<8x256xf32>
    %18 = arith.addf %15, %17 : vector<8x256xf32>
    %cst_13 = arith.constant 5.000000e-01 : f32
    %19 = vector.broadcast %cst_13 : f32 to vector<8x256xf32>
    %20 = arith.mulf %19, %18 : vector<8x256xf32>
    %21 = math.tanh %20 : vector<8x256xf32>
    %cst_14 = arith.constant 5.000000e-01 : f32
    %22 = vector.broadcast %cst_14 : f32 to vector<8x256xf32>
    %23 = arith.mulf %22, %21 : vector<8x256xf32>
    %cst_15 = arith.constant 5.000000e-01 : f32
    %24 = vector.broadcast %cst_15 : f32 to vector<8x256xf32>
    %25 = arith.addf %23, %24 : vector<8x256xf32>
    %26 = arith.truncf %25 : vector<8x256xf32> to vector<8x256xbf16>
    %c0_16 = arith.constant 0 : index
    %c0_17 = arith.constant 0 : index
    %27 = vector.load %arg6[%c0_16, %c0_17] : memref<256x128xbf16, #tpu.memory_space<vmem>>, vector<256x128xbf16>
    %cst_18 = arith.constant dense<0.000000e+00> : vector<8x128xf32>
    %28 = tpu.matmul %26, %27, %cst_18 {dimension_numbers = #tpu.dot_dimension_numbers<[1], [0], [0], [1], [0, 0, 1, 1], [], []>} : vector<8x256xbf16>, vector<256x128xbf16>, vector<8x128xf32> -> vector<8x128xf32>
    %c0_19 = arith.constant 0 : index
    %c0_20 = arith.constant 0 : index
    %29 = vector.load %arg7[%c0_19, %c0_20] : memref<1x128xf32, #tpu.memory_space<vmem>>, vector<1x128xf32>
    %30 = vector.broadcast %29 : vector<1x128xf32> to vector<8x128xf32>
    %31 = arith.addf %28, %30 : vector<8x128xf32>
    %cst_21 = arith.constant dense<0xFF800000> : vector<8xf32>
    %32 = vector.multi_reduction <maximumf>, %31, %cst_21 [1] : vector<8x128xf32> to vector<8xf32>
    %33 = vector.shape_cast %32 : vector<8xf32> to vector<8x1xf32>
    %34 = vector.broadcast %33 : vector<8x1xf32> to vector<8x128xf32>
    %35 = arith.subf %31, %34 : vector<8x128xf32>
    %36 = math.exp %35 : vector<8x128xf32>
    %cst_22 = arith.constant dense<0.000000e+00> : vector<8xf32>
    %37 = vector.multi_reduction <add>, %36, %cst_22 [1] : vector<8x128xf32> to vector<8xf32>
    %38 = vector.shape_cast %37 : vector<8xf32> to vector<8x1xf32>
    %39 = math.log %38 : vector<8x1xf32>
    %40 = vector.broadcast %39 : vector<8x1xf32> to vector<8x128xf32>
    %41 = arith.subf %35, %40 : vector<8x128xf32>
    %42 = arith.truncf %41 : vector<8x128xf32> to vector<8x128xbf16>
    %c0_23 = arith.constant 0 : index
    %c0_24 = arith.constant 0 : index
    %43 = vector.load %arg8[%c0_23, %c0_24] : memref<8x128xbf16, #tpu.memory_space<vmem>>, vector<8x128xbf16>
    tpu.vector_store %arg8[%c0_23, %c0_24], %42 {strides = array<i32>} : memref<8x128xbf16, #tpu.memory_space<vmem>>, vector<8x128xbf16>,
    return
  }
  func.func @transform_0(%arg0: i32) -> (i32, i32) {
    %c0_i32 = arith.constant 0 : i32
    %c0_i32_0 = arith.constant 0 : i32
    return %arg0, %c0_i32 : i32, i32
  }
  func.func @transform_1(%arg0: i32) -> (i32, i32) {
    %c0_i32 = arith.constant 0 : i32
    %c0_i32_0 = arith.constant 0 : i32
    %c0_i32_1 = arith.constant 0 : i32
    return %c0_i32, %c0_i32_0 : i32, i32
  }
  func.func @transform_2(%arg0: i32) -> (i32, i32) {
    %c0_i32 = arith.constant 0 : i32
    %c0_i32_0 = arith.constant 0 : i32
    %c0_i32_1 = arith.constant 0 : i32
    return %c0_i32, %c0_i32_0 : i32, i32
  }
  func.func @transform_3(%arg0: i32) -> (i32, i32) {
    %c0_i32 = arith.constant 0 : i32
    %c0_i32_0 = arith.constant 0 : i32
    %c0_i32_1 = arith.constant 0 : i32
    return %c0_i32, %c0_i32_0 : i32, i32
  }
  func.func @transform_4(%arg0: i32) -> (i32, i32) {
    %c0_i32 = arith.constant 0 : i32
    %c0_i32_0 = arith.constant 0 : i32
    %c0_i32_1 = arith.constant 0 : i32
    return %c0_i32, %c0_i32_0 : i32, i32
  }
  func.func @transform_5(%arg0: i32) -> (i32, i32) {
    %c0_i32 = arith.constant 0 : i32
    %c0_i32_0 = arith.constant 0 : i32
    %c0_i32_1 = arith.constant 0 : i32
    return %c0_i32, %c0_i32_0 : i32, i32
  }
  func.func @transform_6(%arg0: i32) -> (i32, i32) {
    %c0_i32 = arith.constant 0 : i32
    %c0_i32_0 = arith.constant 0 : i32
    %c0_i32_1 = arith.constant 0 : i32
    return %c0_i32, %c0_i32_0 : i32, i32
  }
  func.func @transform_7(%arg0: i32) -> (i32, i32) {
    %c0_i32 = arith.constant 0 : i32
    %c0_i32_0 = arith.constant 0 : i32
    return %arg0, %c0_i32 : i32, i32
  }
}

</mosaic_0001>

<bundles_post_ra>
// kernel: mlp_forward.1
= control target key start
LH: loop header
LB: loop body
LE: loop exit
PB: predicated region body
PF: predicated region fallthrough
CT: control target
= control target key end

     0   :  { %12 = vsyncpa [#allocation3], 0  ;;  %s4033_s0 = inlined_call_operand.vmem [shape: bf16[8,784], index: 0, kind: input, shape index: {}]   ;;  %s4034_s1 = inlined_call_operand.hbm [shape: bf16[784,512], index: 1, kind: input, shape index: {}]   ;;  %s4035_s2 = inlined_call_operand.vmem [shape: f32[1,512], index: 2, kind: input, shape index: {}]   ;;  %s4036_s3 = inlined_call_operand.hbm [shape: bf16[512,256], index: 3, kind: input, shape index: {}]   ;;  %s4037_s4 = inlined_call_operand.vmem [shape: f32[1,256], index: 4, kind: input, shape index: {}]   ;;  %s4038_s5 = inlined_call_operand.vmem [shape: bf16[256,128], index: 5, kind: input, shape index: {}]   ;;  %s4039_s6 = inlined_call_operand.vmem [shape: f32[1,128], index: 6, kind: input, shape index: {}]   ;;  %s4040_s7 = inlined_call_operand.hbm [shape: bf16[8,128], index: 7, kind: output, shape index: {}]  }
   0x1   :  { %13 = vsyncpa [#allocation6], 0 }
   0x2   :  { %14 = vsyncpa [#allocation4], 0  ;;  %s21_s26 = sshll.u32 %s4034_s1, 4  ;;  %s3840_s27 = smov [#allocation2]   ;;  %s22_s26 = int_to_ptr.hbm [resolvable:$true] %s21_s26 }
   0x3   :  { %s23_s28 = sshll.u32 %s3840_s27, 4  ;;  %s36_s8 = sshll.u32 %s4036_s3, 4  ;;  %s24_s28 = int_to_ptr.vmem [resolvable:$true] %s23_s28  ;;  %s37_s8 = int_to_ptr.hbm [resolvable:$true] %s36_s8 }
   0x4   :  { %s3841_s9 = smov 256   ;;  %s3842_s10 = smov 16  }
   0x5   :  { %29 = dma.hbm_to_vmem [thread:$0]  %s22_s26, 25088, %s24_s28, [#allocation3], %s3841_s9, %s3841_s9, %s3842_s10  }
   0x6   :  { %s3843_s11 = smov [#allocation5]   ;;  %s3844_s13 = smov 128  }
   0x7   :  { %s38_s12 = sshll.u32 %s3843_s11, 4  ;;  %s3845_s14 = smov 8   ;;  %s39_s12 = int_to_ptr.vmem [resolvable:$true] %s38_s12 }
   0x8   :  { %44 = dma.hbm_to_vmem [thread:$0]  %s37_s8, 8192, %s39_s12, [#allocation6], %s3844_s13, %s3844_s13, %s3845_s14  }
   0x9   :  { %3834 = dma.done.wait [#allocation3], 25088  }
   0xa   :  { %3835 = vsyncadd [#allocation3], 4294942208 }
   0xb   :  { %3836 = dma.done.wait [#allocation6], 8192  }
   0xc   :  { %3837 = vsyncadd [#allocation6], 4294959104  ;;  %v2468_v0 = vld [vmem:[#allocation2 + $0xe0] sm:$0xf]  ;;  %v3492_v1 = vld [vmem:[#allocation2 + $0xec] sm:$0xf0] }
   0xd   :  { %v2596_v2 = vld [vmem:[#allocation2 + $0x1e0] sm:$0xf]  ;;  %v2469_v3 = vor.u32 %v3492_v1, %v2468_v0  ;;  %v3524_v4 = vld [vmem:[#allocation2 + $0x1ec] sm:$0xf0]  ;;  %vm1274_vm0 = vcmask 130048   ;;  %s3846_s27 = smov [#allocation7]  }
   0xe   :  { %v2724_v5 = vld [vmem:[#allocation2 + $0x2e0] sm:$0xf]  ;;  %v3556_v6 = vld [vmem:[#allocation2 + $0x2ec] sm:$0xf0]  ;;  %v2597_v7 = vor.u32 %v3524_v4, %v2596_v2  ;;  %s2341_s28 = sshll.u32 %s3846_s27, 4  ;;  %s2343_s30 = sshll.u32 %s4040_s7, 4  ;;  %s2342_s28 = int_to_ptr.vmem [resolvable:$true] %s2341_s28  ;;  %s2344_s30 = int_to_ptr.hbm [resolvable:$true] %s2343_s30 }
   0xf   :  { %v2725_v8 = vor.u32 %v3556_v6, %v2724_v5  ;;  %v2852_v9 = vld [vmem:[#allocation2 + $0x3e0] sm:$0xf]  ;;  %v3588_v10 = vld [vmem:[#allocation2 + $0x3ec] sm:$0xf0]  ;;  %1278 = vmatpush.bf16.msra.mxu0 %v2469_v3 }
  0x10   :  { %v2452_v11 = vld [vmem:[#allocation2 + $0xc0] sm:$0xf]  ;;  %v2853_v12 = vor.u32 %v3588_v10, %v2852_v9  ;;  %v3488_v13 = vld [vmem:[#allocation2 + $0xcc] sm:$0xf0]  ;;  %1291 = vmatpush.bf16.msra.mxu1 %v2597_v7 }
  0x11   :  { %v2580_v14 = vld [vmem:[#allocation2 + $0x1c0] sm:$0xf]  ;;  %v3520_v15 = vld [vmem:[#allocation2 + $0x1cc] sm:$0xf0]  ;;  %1304 = vmatpush.bf16.msra.mxu2 %v2725_v8  ;;  %v2453_v16 = vor.u32 %v3488_v13, %v2452_v11 }
  0x12   :  { %v2581_v17 = vor.u32 %v3520_v15, %v2580_v14  ;;  %v2708_v18 = vld [vmem:[#allocation2 + $0x2c0] sm:$0xf]  ;;  %v3552_v19 = vld [vmem:[#allocation2 + $0x2cc] sm:$0xf0]  ;;  %1317 = vmatpush.bf16.msra.mxu3 %v2853_v12 }
  0x13   :  { %v2836_v20 = vld [vmem:[#allocation2 + $0x3c0] sm:$0xf]  ;;  %v2709_v21 = vor.u32 %v3552_v19, %v2708_v18  ;;  %v3584_v22 = vld [vmem:[#allocation2 + $0x3cc] sm:$0xf0]  ;;  %1279 = vmatpush.bf16.msra.mxu0 %v2453_v16 }
  0x14   :  { %v2436_v23 = vld [vmem:[#allocation2 + $0xa0] sm:$0xf]  ;;  %v3484_v24 = vld [vmem:[#allocation2 + $0xac] sm:$0xf0]  ;;  %v2837_v25 = vor.u32 %v3584_v22, %v2836_v20  ;;  %1292 = vmatpush.bf16.msra.mxu1 %v2581_v17 }
  0x15   :  { %v2564_v26 = vld [vmem:[#allocation2 + $0x1a0] sm:$0xf]  ;;  %v3516_v27 = vld [vmem:[#allocation2 + $0x1ac] sm:$0xf0]  ;;  %v2437_v29 = vor.u32 %v3484_v24, %v2436_v23  ;;  %1305 = vmatpush.bf16.msra.mxu2 %v2709_v21 }
  0x16   :  { %v2692_v28 = vld [vmem:[#allocation2 + $0x2a0] sm:$0xf]  ;;  %v3548_v30 = vld [vmem:[#allocation2 + $0x2ac] sm:$0xf0]  ;;  %v2565_v33 = vor.u32 %v3516_v27, %v2564_v26  ;;  %1318 = vmatpush.bf16.msra.mxu3 %v2837_v25  ;;  %v61_v25 = vld [vmem:[%s4033_s0 + $0x8] sm:$0xff] }
  0x17   :  { %v2820_v31 = vld [vmem:[#allocation2 + $0x3a0] sm:$0xf]  ;;  %v3580_v32 = vld [vmem:[#allocation2 + $0x3ac] sm:$0xf0]  ;;  %v2693_v34 = vor.u32 %v3548_v30, %v2692_v28  ;;  %1280 = vmatpush.bf16.msra.mxu0 %v2437_v29 }
  0x18   :  { %v2420_v35 = vld [vmem:[#allocation2 + $0x80] sm:$0xf]  ;;  %v3480_v36 = vld [vmem:[#allocation2 + $0x8c] sm:$0xf0]  ;;  %v2821_v38 = vor.u32 %v3580_v32, %v2820_v31  ;;  %1293 = vmatpush.bf16.msra.mxu1 %v2565_v33 }
  0x19   :  { %v2548_v37 = vld [vmem:[#allocation2 + $0x180] sm:$0xf]  ;;  %v3512_v39 = vld [vmem:[#allocation2 + $0x18c] sm:$0xf0]  ;;  %v2421_v44 = vor.u32 %v3480_v36, %v2420_v35  ;;  %1306 = vmatpush.bf16.msra.mxu2 %v2693_v34  ;;  %v3490_v34 = vld [vmem:[#allocation2 + $0xe4] sm:$0xf]  ;;  %v276_v36 = vunpack.c.l.b16 %v61_v25 }
  0x1a   :  { %v2676_v40 = vld [vmem:[#allocation2 + $0x280] sm:$0xf]  ;;  %v3544_v41 = vld [vmem:[#allocation2 + $0x28c] sm:$0xf0]  ;;  %v2549_v45 = vor.u32 %v3512_v39, %v2548_v37  ;;  %1319 = vmatpush.bf16.msra.mxu3 %v2821_v38  ;;  %v2470_v35 = vld [vmem:[#allocation2 + $0xf0] sm:$0xf0] }
  0x1b   :  { %v2804_v42 = vld [vmem:[#allocation2 + $0x380] sm:$0xf]  ;;  %v3576_v43 = vld [vmem:[#allocation2 + $0x38c] sm:$0xf0]  ;;  %v2677_v46 = vor.u32 %v3544_v41, %v2676_v40  ;;  %1281 = vmatpush.bf16.msra.mxu0 %v2421_v44 }
  0x1c   :  { %v2404_v47 = vld [vmem:[#allocation2 + $0x60] sm:$0xf]  ;;  %v3476_v48 = vld [vmem:[#allocation2 + $0x6c] sm:$0xf0]  ;;  %v2805_v50 = vor.u32 %v3576_v43, %v2804_v42  ;;  %1294 = vmatpush.bf16.msra.mxu1 %v2549_v45  ;;  %v277_v42 = vunpack.c.h.b16 %v61_v25  ;;  %v3510_v25 = vld [vmem:[#allocation2 + $0x184] sm:$0xf] }
  0x1d   :  { %v2532_v49 = vld [vmem:[#allocation2 + $0x160] sm:$0xf]  ;;  %v3508_v51 = vld [vmem:[#allocation2 + $0x16c] sm:$0xf0]  ;;  %v2405_v56 = vor.u32 %v3476_v48, %v2404_v47  ;;  %1307 = vmatpush.bf16.msra.mxu2 %v2677_v46  ;;  %v3522_v46 = vld [vmem:[#allocation2 + $0x1e4] sm:$0xf] }
  0x1e   :  { %v2660_v52 = vld [vmem:[#allocation2 + $0x260] sm:$0xf]  ;;  %v3540_v53 = vld [vmem:[#allocation2 + $0x26c] sm:$0xf0]  ;;  %v2533_v57 = vor.u32 %v3508_v51, %v2532_v49  ;;  %1320 = vmatpush.bf16.msra.mxu3 %v2805_v50  ;;  %v2598_v47 = vld [vmem:[#allocation2 + $0x1f0] sm:$0xf0]  ;;  %v2473_v49 = vor.u32 %v3490_v34, %v2470_v35 }
  0x1f   :  { %v2788_v54 = vld [vmem:[#allocation2 + $0x360] sm:$0xf]  ;;  %v3572_v55 = vld [vmem:[#allocation2 + $0x36c] sm:$0xf0]  ;;  %v2661_v58 = vor.u32 %v3540_v53, %v2660_v52  ;;  %1282 = vmatpush.bf16.msra.mxu0 %v2405_v56  ;;  %v3899_v53 = vpack.c.b16 %v276_v36, %v276_v36  ;;  %v2454_v56 = vld [vmem:[#allocation2 + $0xd0] sm:$0xf0] }
  0x20   :  { %v2388_v59 = vld [vmem:[#allocation2 + $0x40] sm:$0xf]  ;;  %v3472_v60 = vld [vmem:[#allocation2 + $0x4c] sm:$0xf0]  ;;  %v2789_v62 = vor.u32 %v3572_v55, %v2788_v54  ;;  %1295 = vmatpush.bf16.msra.mxu1 %v2533_v57  ;;  %v3486_v55 = vld [vmem:[#allocation2 + $0xc4] sm:$0xf] }
  0x21   :  { %v2516_v61 = vld [vmem:[#allocation2 + $0x140] sm:$0xf]  ;;  %v3504_v63 = vld [vmem:[#allocation2 + $0x14c] sm:$0xf0]  ;;  %v2389_v4 = vor.u32 %v3472_v60, %v2388_v59  ;;  %1308 = vmatpush.bf16.msra.mxu2 %v2661_v58  ;;  %v3903_v60 = vpack.c.b16 %v277_v42, %v277_v42  ;;  %v2406_v34 = vld [vmem:[#allocation2 + $0x70] sm:$0xf0] }
  0x22   :  { %v2644_v0 = vld [vmem:[#allocation2 + $0x240] sm:$0xf]  ;;  %v3536_v1 = vld [vmem:[#allocation2 + $0x24c] sm:$0xf0]  ;;  %v2517_v5 = vor.u32 %v3504_v63, %v2516_v61  ;;  %1321 = vmatpush.bf16.msra.mxu3 %v2789_v62  ;;  %v2601_v61 = vor.u32 %v3522_v46, %v2598_v47  ;;  %v3518_v63 = vld [vmem:[#allocation2 + $0x1c4] sm:$0xf] }
  0x23   :  { %v2772_v2 = vld [vmem:[#allocation2 + $0x340] sm:$0xf]  ;;  %v3568_v3 = vld [vmem:[#allocation2 + $0x34c] sm:$0xf0]  ;;  %v2645_v6 = vor.u32 %v3536_v1, %v2644_v0  ;;  %1283 = vmatpush.bf16.msra.mxu0 %v2389_v4  ;;  %v2582_v0 = vld [vmem:[#allocation2 + $0x1d0] sm:$0xf0] }
  0x24   :  { %v2372_v7 = vld [vmem:[#allocation2 + $0x20] sm:$0xf]  ;;  %v3468_v8 = vld [vmem:[#allocation2 + $0x2c] sm:$0xf0]  ;;  %v2773_v10 = vor.u32 %v3568_v3, %v2772_v2  ;;  %1296 = vmatpush.bf16.msra.mxu1 %v2517_v5  ;;  %v2457_v2 = vor.u32 %v3486_v55, %v2454_v56  ;;  %v3470_v46 = vld [vmem:[#allocation2 + $0x44] sm:$0xf] }
  0x25   :  { %v2500_v9 = vld [vmem:[#allocation2 + $0x120] sm:$0xf]  ;;  %v3500_v11 = vld [vmem:[#allocation2 + $0x12c] sm:$0xf0]  ;;  %v2373_v17 = vor.u32 %v3468_v8, %v2372_v7  ;;  %1309 = vmatpush.bf16.msra.mxu2 %v2645_v6  ;;  %v3482_v8 = vld [vmem:[#allocation2 + $0xa4] sm:$0xf] }
  0x26   :  { %v2628_v12 = vld [vmem:[#allocation2 + $0x220] sm:$0xf]  ;;  %v3532_v13 = vld [vmem:[#allocation2 + $0x22c] sm:$0xf0]  ;;  %v2501_v21 = vor.u32 %v3500_v11, %v2500_v9  ;;  %1322 = vmatpush.bf16.msra.mxu3 %v2773_v10  ;;  %v2438_v9 = vld [vmem:[#allocation2 + $0xb0] sm:$0xf0]  ;;  %v2585_v10 = vor.u32 %v3518_v63, %v2582_v0 }
  0x27   :  { %v2756_v14 = vld [vmem:[#allocation2 + $0x320] sm:$0xf]  ;;  %v3564_v15 = vld [vmem:[#allocation2 + $0x32c] sm:$0xf0]  ;;  %v2629_v22 = vor.u32 %v3532_v13, %v2628_v12  ;;  %1284 = vmatpush.bf16.msra.mxu0 %v2373_v17  ;;  %v3514_v12 = vld [vmem:[#allocation2 + $0x1a4] sm:$0xf] }
  0x28   :  { %v2356_v16 = vld [vmem:[#allocation2] sm:$0xf]  ;;  %v3464_v18 = vld [vmem:[#allocation2 + $0xc] sm:$0xf0]  ;;  %v2757_v26 = vor.u32 %v3564_v15, %v2756_v14  ;;  %1297 = vmatpush.bf16.msra.mxu1 %v2501_v21  ;;  %v2566_v13 = vld [vmem:[#allocation2 + $0x1b0] sm:$0xf0]  ;;  %v2441_v15 = vor.u32 %v3482_v8, %v2438_v9 }
  0x29   :  { %v2484_v19 = vld [vmem:[#allocation2 + $0x100] sm:$0xf]  ;;  %v3496_v20 = vld [vmem:[#allocation2 + $0x10c] sm:$0xf0]  ;;  %v2357_v33 = vor.u32 %v3464_v18, %v2356_v16  ;;  %1310 = vmatpush.bf16.msra.mxu2 %v2629_v22  ;;  %v2422_v21 = vld [vmem:[#allocation2 + $0x90] sm:$0xf0] }
  0x2a   :  { %v2612_v23 = vld [vmem:[#allocation2 + $0x200] sm:$0xf]  ;;  %v3528_v24 = vld [vmem:[#allocation2 + $0x20c] sm:$0xf0]  ;;  %v2485_v38 = vor.u32 %v3496_v20, %v2484_v19  ;;  %1323 = vmatpush.bf16.msra.mxu3 %v2757_v26  ;;  %v3478_v20 = vld [vmem:[#allocation2 + $0x84] sm:$0xf] }
  0x2b   :  { %v2740_v27 = vld [vmem:[#allocation2 + $0x300] sm:$0xf]  ;;  %v3560_v28 = vld [vmem:[#allocation2 + $0x30c] sm:$0xf0]  ;;  %v2613_v39 = vor.u32 %v3528_v24, %v2612_v23  ;;  %1285 = vmatpush.bf16.msra.mxu0 %v2357_v33  ;;  %v63_v22 = vld [vmem:[%s4033_s0 + $0x18] sm:$0xf]  ;;  %v2569_v23 = vor.u32 %v3514_v12, %v2566_v13 }
  0x2c   :  { %v2980_v29 = vld [vmem:[#allocation2 + $0x4e0] sm:$0xf]  ;;  %v3620_v30 = vld [vmem:[#allocation2 + $0x4ec] sm:$0xf0]  ;;  %v2741_v43 = vor.u32 %v3560_v28, %v2740_v27  ;;  %1298 = vmatpush.bf16.msra.mxu1 %v2485_v38  ;;  %v2550_v26 = vld [vmem:[#allocation2 + $0x190] sm:$0xf0]  ;;  %v2425_v28 = vor.u32 %v3478_v20, %v2422_v21  ;;  %v280_v35 = vunpack.c.l.b16 %v63_v22 }
  0x2d   :  { %v3108_v31 = vld [vmem:[#allocation2 + $0x5e0] sm:$0xf]  ;;  %v3652_v32 = vld [vmem:[#allocation2 + $0x5ec] sm:$0xf0]  ;;  %v2981_v44 = vor.u32 %v3620_v30, %v2980_v29  ;;  %1311 = vmatpush.bf16.msra.mxu2 %v2613_v39  ;;  %v3474_v33 = vld [vmem:[#allocation2 + $0x64] sm:$0xf]  ;;  %v2553_v36 = vor.u32 %v3510_v25, %v2550_v26 }
  0x2e   :  { %v60_v37 = vld [vmem:[%s4033_s0] sm:$0xff]  ;;  %v3656_v45 = vld [vmem:[#allocation2 + $0x60c] sm:$0xf0]  ;;  %v3109_v48 = vor.u32 %v3652_v32, %v3108_v31  ;;  %1324 = vmatpush.bf16.msra.mxu3 %v2741_v43  ;;  %v2534_v39 = vld [vmem:[#allocation2 + $0x170] sm:$0xf0] }
  0x2f   :  { %v3124_v40 = vld [vmem:[#allocation2 + $0x600] sm:$0xf]  ;;  %v274_v41 = vunpack.c.l.b16 %v60_v37  ;;  %v3616_v51 = vld [vmem:[#allocation2 + $0x4cc] sm:$0xf0]  ;;  %v275_v58 = vunpack.c.h.b16 %v60_v37  ;;  %1330 = vmatpush.bf16.msrb.mxu0 %v2981_v44  ;;  %v3506_v38 = vld [vmem:[#allocation2 + $0x164] sm:$0xf] }
  0x30   :  { %v2964_v50 = vld [vmem:[#allocation2 + $0x4c0] sm:$0xf]  ;;  %v3648_v54 = vld [vmem:[#allocation2 + $0x5cc] sm:$0xf0]  ;;  %v3125_v59 = vor.u32 %v3656_v45, %v3124_v40  ;;  %1343 = vmatpush.bf16.msrb.mxu1 %v3109_v48  ;;  %1312 = vmatmul.bf16.vlgmr.msra.gmra.mxu2 %v3899_v53  ;;  %v2390_v47 = vld [vmem:[#allocation2 + $0x50] sm:$0xf0]  ;;  %v3914_v48 = vpack.c.b16 %v280_v35, %v280_v35 }
  0x31   :  { %v3092_v52 = vld [vmem:[#allocation2 + $0x5c0] sm:$0xf]  ;;  %v3901_v57 = vpack.c.b16 %v274_v41, %v274_v41  ;;  %v2965_v62 = vor.u32 %v3616_v51, %v2964_v50  ;;  %v3612_v4 = vld [vmem:[#allocation2 + $0x4ac] sm:$0xf0]  ;;  %v3907_v6 = vpack.c.b16 %v275_v58, %v275_v58  ;;  %1325 = vmatmul.bf16.vlgmr.msra.gmra.mxu3 %v3903_v60  ;;  %v2409_v41 = vor.u32 %v3474_v33, %v2406_v34  ;;  %v3502_v51 = vld [vmem:[#allocation2 + $0x144] sm:$0xf] }
  0x32   :  { %1369 = vmatpush.bf16.msrb.mxu3 %v2473_v49  ;;  %v3093_v1 = vor.u32 %v3648_v54, %v3092_v52  ;;  %v2948_v3 = vld [vmem:[#allocation2 + $0x4a0] sm:$0xf]  ;;  %v3644_v7 = vld [vmem:[#allocation2 + $0x5ac] sm:$0xf0]  ;;  %1363 = vmatpush.bf16.msrb.mxu2 %v3125_v59  ;;  %v2537_v49 = vor.u32 %v3506_v38, %v2534_v39  ;;  %v2518_v52 = vld [vmem:[#allocation2 + $0x150] sm:$0xf0]  ;;  %v2393_v55 = vor.u32 %v3470_v46, %v2390_v47 }
  0x33   :  { %v3076_v5 = vld [vmem:[#allocation2 + $0x5a0] sm:$0xf]  ;;  %1286 = vmatmul.bf16.vlgmr.msra.gmra.mxu0 %v3901_v57  ;;  %v2949_v11 = vor.u32 %v3612_v4, %v2948_v3  ;;  %v3608_v17 = vld [vmem:[#allocation2 + $0x48c] sm:$0xf0]  ;;  %1299 = vmatmul.bf16.vlgmr.msra.gmra.mxu1 %v3907_v6  ;;  %v2374_v63 = vld [vmem:[#allocation2 + $0x30] sm:$0xf0] }
  0x34   :  { %1331 = vmatpush.bf16.msrb.mxu0 %v2965_v62  ;;  %1344 = vmatpush.bf16.msrb.mxu1 %v3093_v1  ;;  %v3077_v14 = vor.u32 %v3644_v7, %v3076_v5  ;;  %v2932_v16 = vld [vmem:[#allocation2 + $0x480] sm:$0xf]  ;;  %v3640_v19 = vld [vmem:[#allocation2 + $0x58c] sm:$0xf0]  ;;  %v3466_v62 = vld [vmem:[#allocation2 + $0x24] sm:$0xf]  ;;  %v2521_v1 = vor.u32 %v3502_v51, %v2518_v52 }
  0x35   :  { %v3060_v18 = vld [vmem:[#allocation2 + $0x580] sm:$0xf]  ;;  %v2933_v24 = vor.u32 %v3608_v17, %v2932_v16  ;;  %v3604_v30 = vld [vmem:[#allocation2 + $0x46c] sm:$0xf0]  ;;  %v3498_v0 = vld [vmem:[#allocation2 + $0x124] sm:$0xf]  ;;  %v2377_v8 = vor.u32 %v3466_v62, %v2374_v63 }
  0x36   :  { %1382 = vmatpush.bf16.msra.mxu2 %v2601_v61  ;;  %1370 = vmatpush.bf16.msrb.mxu3 %v2457_v2  ;;  %v3061_v27 = vor.u32 %v3640_v19, %v3060_v18  ;;  %v2916_v29 = vld [vmem:[#allocation2 + $0x460] sm:$0xf]  ;;  %v3636_v32 = vld [vmem:[#allocation2 + $0x56c] sm:$0xf0]  ;;  %v2502_v3 = vld [vmem:[#allocation2 + $0x130] sm:$0xf0] }
  0x37   :  { %v3044_v31 = vld [vmem:[#allocation2 + $0x560] sm:$0xf]  ;;  %v2917_v37 = vor.u32 %v3604_v30, %v2916_v29  ;;  %v3600_v43 = vld [vmem:[#allocation2 + $0x44c] sm:$0xf0]  ;;  %v3462_v12 = vld [vmem:[#allocation2 + $0x4] sm:$0xf]  ;;  %v2505_v19 = vor.u32 %v3498_v0, %v2502_v3 }
  0x38   :  { %1332 = vmatpush.bf16.msrb.mxu0 %v2949_v11  ;;  %1345 = vmatpush.bf16.msrb.mxu1 %v3077_v14  ;;  %v3045_v40 = vor.u32 %v3636_v32, %v3044_v31  ;;  %v2900_v42 = vld [vmem:[#allocation2 + $0x440] sm:$0xf]  ;;  %v3632_v45 = vld [vmem:[#allocation2 + $0x54c] sm:$0xf0]  ;;  %v2358_v13 = vld [vmem:[#allocation2 + $0x10] sm:$0xf0] }
  0x39   :  { %v3028_v44 = vld [vmem:[#allocation2 + $0x540] sm:$0xf]  ;;  %v2901_v50 = vor.u32 %v3600_v43, %v2900_v42  ;;  %v3596_v58 = vld [vmem:[#allocation2 + $0x42c] sm:$0xf0]  ;;  %v3554_v14 = vld [vmem:[#allocation2 + $0x2e4] sm:$0xf]  ;;  %v2361_v25 = vor.u32 %v3462_v12, %v2358_v13 }
  0x3a   :  { %1383 = vmatpush.bf16.msra.mxu2 %v2585_v10  ;;  %1371 = vmatpush.bf16.msrb.mxu3 %v2441_v15  ;;  %v3029_v54 = vor.u32 %v3632_v45, %v3028_v44  ;;  %v2884_v56 = vld [vmem:[#allocation2 + $0x420] sm:$0xf]  ;;  %v3628_v61 = vld [vmem:[#allocation2 + $0x52c] sm:$0xf0]  ;;  %v2726_v15 = vld [vmem:[#allocation2 + $0x2f0] sm:$0xf0] }
  0x3b   :  { %v3012_v59 = vld [vmem:[#allocation2 + $0x520] sm:$0xf]  ;;  %v2885_v2 = vor.u32 %v3596_v58, %v2884_v56  ;;  %v62_v5 = vld [vmem:[%s4033_s0 + $0x10] sm:$0xff]  ;;  %v3586_v16 = vld [vmem:[#allocation2 + $0x3e4] sm:$0xf] }
  0x3c   :  { %1333 = vmatpush.bf16.msrb.mxu0 %v2933_v24  ;;  %1346 = vmatpush.bf16.msrb.mxu1 %v3061_v27  ;;  %v2868_v4 = vld [vmem:[#allocation2 + $0x400] sm:$0xf]  ;;  %v3013_v7 = vor.u32 %v3628_v61, %v3012_v59  ;;  %v3592_v9 = vld [vmem:[#allocation2 + $0x40c] sm:$0xf0]  ;;  %v2854_v17 = vld [vmem:[#allocation2 + $0x3f0] sm:$0xf0]  ;;  %v278_v18 = vunpack.c.l.b16 %v62_v5 }
  0x3d   :  { %v2996_v10 = vld [vmem:[#allocation2 + $0x500] sm:$0xf]  ;;  %v3624_v11 = vld [vmem:[#allocation2 + $0x50c] sm:$0xf0]  ;;  %v2869_v20 = vor.u32 %v3592_v9, %v2868_v4  ;;  %v3618_v21 = vld [vmem:[#allocation2 + $0x4e4] sm:$0xf]  ;;  %v2857_v29 = vor.u32 %v3586_v16, %v2854_v17 }
  0x3e   :  { %1384 = vmatpush.bf16.msra.mxu2 %v2569_v23  ;;  %1372 = vmatpush.bf16.msrb.mxu3 %v2425_v28  ;;  %v2982_v22 = vld [vmem:[#allocation2 + $0x4f0] sm:$0xf0]  ;;  %v279_v23 = vunpack.c.h.b16 %v62_v5  ;;  %v2997_v24 = vor.u32 %v3624_v11, %v2996_v10  ;;  %v3494_v26 = vld [vmem:[#allocation2 + $0x104] sm:$0xf]  ;;  %v2729_v28 = vor.u32 %v3554_v14, %v2726_v15  ;;  %v3921_v34 = vpack.c.b16 %v278_v18, %v278_v18 }
  0x3f   :  { %v2486_v27 = vld [vmem:[#allocation2 + $0x110] sm:$0xf0]  ;;  %v3650_v30 = vld [vmem:[#allocation2 + $0x5e4] sm:$0xf]  ;;  %v2985_v33 = vor.u32 %v3618_v21, %v2982_v22 }
  0x40   :  { %1334 = vmatpush.bf16.msrb.mxu0 %v2917_v37  ;;  %1347 = vmatpush.bf16.msrb.mxu1 %v3045_v40  ;;  %v3110_v31 = vld [vmem:[#allocation2 + $0x5f0] sm:$0xf0]  ;;  %v3550_v32 = vld [vmem:[#allocation2 + $0x2c4] sm:$0xf]  ;;  %v2489_v38 = vor.u32 %v3494_v26, %v2486_v27  ;;  %v3923_v39 = vpack.c.b16 %v279_v23, %v279_v23 }
  0x41   :  { %3138 = vmatmul.msk.bf16.vlgmr.msrb.gmra.mxu2 %vm1274_vm0, %v3914_v48  ;;  %v2710_v35 = vld [vmem:[#allocation2 + $0x2d0] sm:$0xf0]  ;;  %v3614_v40 = vld [vmem:[#allocation2 + $0x4c4] sm:$0xf]  ;;  %v3113_v42 = vor.u32 %v3650_v30, %v3110_v31 }
  0x42   :  { %1385 = vmatpush.bf16.msra.mxu2 %v2553_v36  ;;  %1373 = vmatpush.bf16.msrb.mxu3 %v2409_v41  ;;  %v3582_v36 = vld [vmem:[#allocation2 + $0x3c4] sm:$0xf]  ;;  %v2838_v37 = vld [vmem:[#allocation2 + $0x3d0] sm:$0xf0]  ;;  %v2713_v43 = vor.u32 %v3550_v32, %v2710_v35 }
  0x43   :  { %v2966_v41 = vld [vmem:[#allocation2 + $0x4d0] sm:$0xf0]  ;;  %v2841_v44 = vor.u32 %v3582_v36, %v2838_v37  ;;  %v3646_v45 = vld [vmem:[#allocation2 + $0x5c4] sm:$0xf] }
  0x44   :  { %1335 = vmatpush.bf16.msrb.mxu0 %v2901_v50  ;;  %1348 = vmatpush.bf16.msrb.mxu1 %v3029_v54  ;;  %v3094_v46 = vld [vmem:[#allocation2 + $0x5d0] sm:$0xf0]  ;;  %v3546_v47 = vld [vmem:[#allocation2 + $0x2a4] sm:$0xf] }
  0x45   :  { %v2694_v50 = vld [vmem:[#allocation2 + $0x2b0] sm:$0xf0]  ;;  %v3578_v51 = vld [vmem:[#allocation2 + $0x3a4] sm:$0xf]  ;;  %v3097_v56 = vor.u32 %v3646_v45, %v3094_v46 }
  0x46   :  { %1386 = vmatpush.bf16.msra.mxu2 %v2537_v49  ;;  %1374 = vmatpush.bf16.msrb.mxu3 %v2393_v55  ;;  %v2969_v49 = vor.u32 %v3614_v40, %v2966_v41  ;;  %v2822_v52 = vld [vmem:[#allocation2 + $0x3b0] sm:$0xf0]  ;;  %v3610_v54 = vld [vmem:[#allocation2 + $0x4a4] sm:$0xf]  ;;  %v2697_v58 = vor.u32 %v3546_v47, %v2694_v50 }
  0x47   :  { %v2950_v55 = vld [vmem:[#allocation2 + $0x4b0] sm:$0xf0]  ;;  %v2825_v59 = vor.u32 %v3578_v51, %v2822_v52  ;;  %v3642_v61 = vld [vmem:[#allocation2 + $0x5a4] sm:$0xf] }
  0x48   :  { %1336 = vmatpush.bf16.msrb.mxu0 %v2885_v2  ;;  %1349 = vmatpush.bf16.msrb.mxu1 %v3013_v7  ;;  %v3078_v62 = vld [vmem:[#allocation2 + $0x5b0] sm:$0xf0]  ;;  %v3542_v63 = vld [vmem:[#allocation2 + $0x284] sm:$0xf]  ;;  %v2953_v0 = vor.u32 %v3610_v54, %v2950_v55 }
  0x49   :  { %v3574_v2 = vld [vmem:[#allocation2 + $0x384] sm:$0xf]  ;;  %v2806_v3 = vld [vmem:[#allocation2 + $0x390] sm:$0xf0]  ;;  %v3081_v7 = vor.u32 %v3642_v61, %v3078_v62  ;;  %v2476_v61 = vld [vmem:[#allocation2 + $0xe8] sm:$0xf] }
  0x4a   :  { %1387 = vmatpush.bf16.msra.mxu2 %v2521_v1  ;;  %1375 = vmatpush.bf16.msrb.mxu3 %v2377_v8  ;;  %v2678_v1 = vld [vmem:[#allocation2 + $0x290] sm:$0xf0]  ;;  %v3606_v4 = vld [vmem:[#allocation2 + $0x484] sm:$0xf]  ;;  %v2809_v9 = vor.u32 %v3574_v2, %v2806_v3  ;;  %v3493_v62 = vld [vmem:[#allocation2 + $0xf4] sm:$0xf0] }
  0x4b   :  { %v2934_v5 = vld [vmem:[#allocation2 + $0x490] sm:$0xf0]  ;;  %v2681_v8 = vor.u32 %v3542_v63, %v2678_v1  ;;  %v3638_v10 = vld [vmem:[#allocation2 + $0x584] sm:$0xf]  ;;  %v2604_v63 = vld [vmem:[#allocation2 + $0x1e8] sm:$0xf] }
  0x4c   :  { %1337 = vmatpush.bf16.msrb.mxu0 %v2869_v20  ;;  %1350 = vmatpush.bf16.msrb.mxu1 %v2997_v24  ;;  %v3062_v11 = vld [vmem:[#allocation2 + $0x590] sm:$0xf0]  ;;  %v3538_v12 = vld [vmem:[#allocation2 + $0x264] sm:$0xf]  ;;  %v2937_v13 = vor.u32 %v3606_v4, %v2934_v5  ;;  %v3525_v1 = vld [vmem:[#allocation2 + $0x1f4] sm:$0xf0] }
  0x4d   :  { %v2662_v14 = vld [vmem:[#allocation2 + $0x270] sm:$0xf0]  ;;  %v3570_v15 = vld [vmem:[#allocation2 + $0x364] sm:$0xf] }
  0x4e   :  { %1388 = vmatpush.bf16.msra.mxu2 %v2505_v19  ;;  %1376 = vmatpush.bf16.msrb.mxu3 %v2361_v25  ;;  %v2790_v16 = vld [vmem:[#allocation2 + $0x370] sm:$0xf0]  ;;  %v3602_v17 = vld [vmem:[#allocation2 + $0x464] sm:$0xf]  ;;  %v3065_v19 = vor.u32 %v3638_v10, %v3062_v11  ;;  %v2665_v20 = vor.u32 %v3538_v12, %v2662_v14  ;;  %v2477_v10 = vor.u32 %v3493_v62, %v2476_v61  ;;  %v2860_v11 = vld [vmem:[#allocation2 + $0x3e8] sm:$0xf] }
  0x4f   :  { %1338 = vmatmul.bf16.vlgmr.msrb.gmra.mxu0 %v3921_v34  ;;  %1351 = vmatmul.bf16.vlgmr.msrb.gmra.mxu1 %v3923_v39  ;;  %v2918_v18 = vld [vmem:[#allocation2 + $0x470] sm:$0xf0]  ;;  %v2793_v21 = vor.u32 %v3570_v15, %v2790_v16  ;;  %v3634_v22 = vld [vmem:[#allocation2 + $0x564] sm:$0xf]  ;;  %v3589_v12 = vld [vmem:[#allocation2 + $0x3f4] sm:$0xf0]  ;;  %v2605_v14 = vor.u32 %v3525_v1, %v2604_v63 }
  0x50   :  { %1395 = vmatpush.bf16.msra.mxu0 %v2729_v28  ;;  %1408 = vmatpush.bf16.msra.mxu1 %v2857_v29  ;;  %v3046_v23 = vld [vmem:[#allocation2 + $0x570] sm:$0xf0]  ;;  %v3534_v24 = vld [vmem:[#allocation2 + $0x244] sm:$0xf]  ;;  %v2921_v25 = vor.u32 %v3602_v17, %v2918_v18  ;;  %v3489_v15 = vld [vmem:[#allocation2 + $0xd4] sm:$0xf0] }
  0x51   :  { %1377 = vmatmul.bf16.vlgmr.msrb.gmra.mxu3 %v3901_v57  ;;  %v2646_v26 = vld [vmem:[#allocation2 + $0x250] sm:$0xf0]  ;;  %v3566_v27 = vld [vmem:[#allocation2 + $0x344] sm:$0xf]  ;;  %v3049_v31 = vor.u32 %v3634_v22, %v3046_v23  ;;  %v2732_v17 = vld [vmem:[#allocation2 + $0x2e8] sm:$0xf]  ;;  %v2861_v22 = vor.u32 %v3589_v12, %v2860_v11 }
  0x52   :  { %1421 = vmatpush.bf16.msra.mxu3 %v2985_v33  ;;  %1389 = vmatpush.bf16.msra.mxu2 %v2489_v38  ;;  %v2774_v28 = vld [vmem:[#allocation2 + $0x350] sm:$0xf0]  ;;  %v3598_v29 = vld [vmem:[#allocation2 + $0x444] sm:$0xf]  ;;  %v2649_v33 = vor.u32 %v3534_v24, %v2646_v26  ;;  %v3557_v18 = vld [vmem:[#allocation2 + $0x2f4] sm:$0xf0] }
  0x53   :  { %v2902_v30 = vld [vmem:[#allocation2 + $0x450] sm:$0xf0]  ;;  %v3630_v32 = vld [vmem:[#allocation2 + $0x544] sm:$0xf]  ;;  %v2777_v35 = vor.u32 %v3566_v27, %v2774_v28  ;;  %v2844_v24 = vld [vmem:[#allocation2 + $0x3c8] sm:$0xf]  ;;  %v2733_v27 = vor.u32 %v3557_v18, %v2732_v17 }
  0x54   :  { %1396 = vmatpush.bf16.msra.mxu0 %v2713_v43  ;;  %1409 = vmatpush.bf16.msra.mxu1 %v2841_v44  ;;  %v3030_v36 = vld [vmem:[#allocation2 + $0x550] sm:$0xf0]  ;;  %v3530_v37 = vld [vmem:[#allocation2 + $0x224] sm:$0xf]  ;;  %v2905_v40 = vor.u32 %v3598_v29, %v2902_v30  ;;  %v2444_v26 = vld [vmem:[#allocation2 + $0xa8] sm:$0xf] }
  0x55   :  { %1390 = vmatmul.bf16.vlgmr.msra.gmra.mxu2 %v3907_v6  ;;  %v2630_v38 = vld [vmem:[#allocation2 + $0x230] sm:$0xf0]  ;;  %v3562_v41 = vld [vmem:[#allocation2 + $0x324] sm:$0xf]  ;;  %v3033_v45 = vor.u32 %v3630_v32, %v3030_v36  ;;  %v3485_v29 = vld [vmem:[#allocation2 + $0xb4] sm:$0xf0] }
  0x56   :  { %1434 = vmatpush.bf16.msrb.mxu2 %v3113_v42  ;;  %1422 = vmatpush.bf16.msra.mxu3 %v2969_v49  ;;  %v2758_v42 = vld [vmem:[#allocation2 + $0x330] sm:$0xf0]  ;;  %v3594_v43 = vld [vmem:[#allocation2 + $0x424] sm:$0xf]  ;;  %v2633_v49 = vor.u32 %v3530_v37, %v2630_v38  ;;  %v2716_v30 = vld [vmem:[#allocation2 + $0x2c8] sm:$0xf]  ;;  %v2445_v36 = vor.u32 %v3485_v29, %v2444_v26 }
  0x57   :  { %v2886_v44 = vld [vmem:[#allocation2 + $0x430] sm:$0xf0]  ;;  %v3626_v46 = vld [vmem:[#allocation2 + $0x524] sm:$0xf]  ;;  %v2761_v50 = vor.u32 %v3562_v41, %v2758_v42  ;;  %v2572_v32 = vld [vmem:[#allocation2 + $0x1a8] sm:$0xf] }
  0x58   :  { %1397 = vmatpush.bf16.msra.mxu0 %v2697_v58  ;;  %1410 = vmatpush.bf16.msra.mxu1 %v2825_v59  ;;  %v3014_v47 = vld [vmem:[#allocation2 + $0x530] sm:$0xf0]  ;;  %v3526_v51 = vld [vmem:[#allocation2 + $0x204] sm:$0xf]  ;;  %v2889_v55 = vor.u32 %v3594_v43, %v2886_v44  ;;  %v2828_v37 = vld [vmem:[#allocation2 + $0x3a8] sm:$0xf] }
  0x59   :  { %v2614_v52 = vld [vmem:[#allocation2 + $0x210] sm:$0xf0]  ;;  %v3558_v54 = vld [vmem:[#allocation2 + $0x304] sm:$0xf]  ;;  %v3581_v38 = vld [vmem:[#allocation2 + $0x3b4] sm:$0xf0] }
  0x5a   :  { %1435 = vmatpush.bf16.msrb.mxu2 %v3097_v56  ;;  %1423 = vmatpush.bf16.msra.mxu3 %v2953_v0  ;;  %v2742_v56 = vld [vmem:[#allocation2 + $0x310] sm:$0xf0]  ;;  %v3590_v58 = vld [vmem:[#allocation2 + $0x404] sm:$0xf]  ;;  %v3017_v0 = vor.u32 %v3626_v46, %v3014_v47  ;;  %v2617_v4 = vor.u32 %v3526_v51, %v2614_v52  ;;  %v3481_v43 = vld [vmem:[#allocation2 + $0x94] sm:$0xf0] }
  0x5b   :  { %v2870_v59 = vld [vmem:[#allocation2 + $0x410] sm:$0xf0]  ;;  %v3654_v2 = vld [vmem:[#allocation2 + $0x604] sm:$0xf]  ;;  %v2745_v5 = vor.u32 %v3558_v54, %v2742_v56  ;;  %v2700_v44 = vld [vmem:[#allocation2 + $0x2a8] sm:$0xf] }
  0x5c   :  { %1398 = vmatpush.bf16.msra.mxu0 %v2681_v8  ;;  %1411 = vmatpush.bf16.msra.mxu1 %v2809_v9  ;;  %v3126_v3 = vld [vmem:[#allocation2 + $0x610] sm:$0xf0]  ;;  %v2873_v9 = vor.u32 %v3590_v58, %v2870_v59  ;;  %v2556_v46 = vld [vmem:[#allocation2 + $0x188] sm:$0xf]  ;;  %v3513_v47 = vld [vmem:[#allocation2 + $0x194] sm:$0xf0] }
  0x5d   :  { %v2998_v8 = vld [vmem:[#allocation2 + $0x510] sm:$0xf0]  ;;  %v3129_v16 = vor.u32 %v3654_v2, %v3126_v3  ;;  %v2812_v51 = vld [vmem:[#allocation2 + $0x388] sm:$0xf]  ;;  %v3577_v52 = vld [vmem:[#allocation2 + $0x394] sm:$0xf0]  ;;  %v2557_v56 = vor.u32 %v3513_v47, %v2556_v46 }
  0x5e   :  { %1436 = vmatpush.bf16.msrb.mxu2 %v3081_v7  ;;  %1424 = vmatpush.bf16.msra.mxu3 %v2937_v13  ;;  %v3622_v7 = vld [vmem:[#allocation2 + $0x504] sm:$0xf]  ;;  %v2460_v13 = vld [vmem:[#allocation2 + $0xc8] sm:$0xf]  ;;  %v3477_v58 = vld [vmem:[#allocation2 + $0x74] sm:$0xf0] }
  0x5f   :  { %v2461_v23 = vor.u32 %v3489_v15, %v2460_v13  ;;  %v2412_v54 = vld [vmem:[#allocation2 + $0x68] sm:$0xf]  ;;  %v3545_v61 = vld [vmem:[#allocation2 + $0x294] sm:$0xf0] }
  0x60   :  { %1399 = vmatpush.bf16.msra.mxu0 %v2665_v20  ;;  %1412 = vmatpush.bf16.msra.mxu1 %v2793_v21  ;;  %v2588_v20 = vld [vmem:[#allocation2 + $0x1c8] sm:$0xf]  ;;  %v3521_v21 = vld [vmem:[#allocation2 + $0x1d4] sm:$0xf0]  ;;  %v2413_v1 = vor.u32 %v3477_v58, %v2412_v54 }
  0x61   :  { %v2589_v28 = vor.u32 %v3521_v21, %v2588_v20  ;;  %v2684_v59 = vld [vmem:[#allocation2 + $0x288] sm:$0xf]  ;;  %v3509_v63 = vld [vmem:[#allocation2 + $0x174] sm:$0xf0] }
  0x62   :  { %1437 = vmatpush.bf16.msrb.mxu2 %v3065_v19  ;;  %1425 = vmatpush.bf16.msra.mxu3 %v2921_v25  ;;  %v3001_v19 = vor.u32 %v3622_v7, %v2998_v8  ;;  %v3585_v25 = vld [vmem:[#allocation2 + $0x3d4] sm:$0xf0]  ;;  %v2540_v62 = vld [vmem:[#allocation2 + $0x168] sm:$0xf] }
  0x63   :  { %v2796_v2 = vld [vmem:[#allocation2 + $0x368] sm:$0xf]  ;;  %v3573_v3 = vld [vmem:[#allocation2 + $0x374] sm:$0xf0]  ;;  %v2541_v7 = vor.u32 %v3509_v63, %v2540_v62 }
  0x64   :  { %1400 = vmatpush.bf16.msra.mxu0 %v2649_v33  ;;  %1413 = vmatpush.bf16.msra.mxu1 %v2777_v35  ;;  %v3517_v33 = vld [vmem:[#allocation2 + $0x1b4] sm:$0xf0]  ;;  %v2845_v35 = vor.u32 %v3585_v25, %v2844_v24  ;;  %v2524_v11 = vld [vmem:[#allocation2 + $0x148] sm:$0xf]  ;;  %v2797_v13 = vor.u32 %v3573_v3, %v2796_v2 }
  0x65   :  { %v2573_v42 = vor.u32 %v3517_v33, %v2572_v32  ;;  %v3473_v8 = vld [vmem:[#allocation2 + $0x54] sm:$0xf0]  ;;  %v2780_v15 = vld [vmem:[#allocation2 + $0x348] sm:$0xf] }
  0x66   :  { %1438 = vmatpush.bf16.msrb.mxu2 %v3049_v31  ;;  %1426 = vmatpush.bf16.msra.mxu3 %v2905_v40  ;;  %v3553_v31 = vld [vmem:[#allocation2 + $0x2d4] sm:$0xf0]  ;;  %v2428_v40 = vld [vmem:[#allocation2 + $0x88] sm:$0xf] }
  0x67   :  { %v2717_v41 = vor.u32 %v3553_v31, %v2716_v30  ;;  %v3505_v12 = vld [vmem:[#allocation2 + $0x154] sm:$0xf0]  ;;  %v2380_v17 = vld [vmem:[#allocation2 + $0x28] sm:$0xf] }
  0x68   :  { %1401 = vmatpush.bf16.msra.mxu0 %v2633_v49  ;;  %1414 = vmatpush.bf16.msra.mxu1 %v2761_v50  ;;  %v2829_v49 = vor.u32 %v3581_v38, %v2828_v37  ;;  %v2429_v50 = vor.u32 %v3481_v43, %v2428_v40  ;;  %v3469_v20 = vld [vmem:[#allocation2 + $0x34] sm:$0xf0]  ;;  %v2652_v21 = vld [vmem:[#allocation2 + $0x248] sm:$0xf] }
  0x69   :  { %v3501_v24 = vld [vmem:[#allocation2 + $0x134] sm:$0xf0]  ;;  %v2764_v26 = vld [vmem:[#allocation2 + $0x328] sm:$0xf] }
  0x6a   :  { %1439 = vmatpush.bf16.msrb.mxu2 %v3033_v45  ;;  %1427 = vmatpush.bf16.msra.mxu3 %v2889_v55  ;;  %v3549_v45 = vld [vmem:[#allocation2 + $0x2b4] sm:$0xf0]  ;;  %v2364_v29 = vld [vmem:[#allocation2 + $0x8] sm:$0xf] }
  0x6b   :  { %v2701_v55 = vor.u32 %v3549_v45, %v2700_v44  ;;  %v3465_v30 = vld [vmem:[#allocation2 + $0x14] sm:$0xf0]  ;;  %v2492_v33 = vld [vmem:[#allocation2 + $0x108] sm:$0xf] }
  0x6c   :  { %1402 = vmatpush.bf16.msra.mxu0 %v2617_v4  ;;  %1415 = vmatpush.bf16.msra.mxu1 %v2745_v5  ;;  %v2396_v4 = vld [vmem:[#allocation2 + $0x48] sm:$0xf]  ;;  %v2685_v5 = vor.u32 %v3545_v61, %v2684_v59  ;;  %v3497_v37 = vld [vmem:[#allocation2 + $0x114] sm:$0xf0]  ;;  %v2365_v45 = vor.u32 %v3465_v30, %v2364_v29  ;;  %v3479_v29 = vld [vmem:[#allocation2 + $0x8c] sm:$0xf] }
  0x6d   :  { %v2988_v38 = vld [vmem:[#allocation2 + $0x4e8] sm:$0xf]  ;;  %v3621_v40 = vld [vmem:[#allocation2 + $0x4f4] sm:$0xf0] }
  0x6e   :  { %1440 = vmatpush.bf16.msrb.mxu2 %v3017_v0  ;;  %1428 = vmatpush.bf16.msra.mxu3 %v2873_v9  ;;  %v2813_v0 = vor.u32 %v3577_v52, %v2812_v51  ;;  %v2668_v9 = vld [vmem:[#allocation2 + $0x268] sm:$0xf]  ;;  %v3653_v43 = vld [vmem:[#allocation2 + $0x5f4] sm:$0xf0]  ;;  %v2493_v51 = vor.u32 %v3497_v37, %v2492_v33  ;;  %v2989_v52 = vor.u32 %v3621_v40, %v2988_v38  ;;  %v3515_v33 = vld [vmem:[#allocation2 + $0x1ac] sm:$0xf] }
  0x6f   :  { %1403 = vmatmul.bf16.vlgmr.msra.gmra.mxu0 %v3899_v53  ;;  %1416 = vmatmul.bf16.vlgmr.msra.gmra.mxu1 %v3903_v60  ;;  %v2748_v44 = vld [vmem:[#allocation2 + $0x308] sm:$0xf]  ;;  %v3561_v46 = vld [vmem:[#allocation2 + $0x314] sm:$0xf0] }
  0x70   :  { %1460 = vmatpush.bf16.msrb.mxu1 %v2477_v10  ;;  %1454 = vmatpush.bf16.msrb.mxu0 %v3129_v16  ;;  %v3541_v10 = vld [vmem:[#allocation2 + $0x274] sm:$0xf0]  ;;  %v2972_v54 = vld [vmem:[#allocation2 + $0x4c8] sm:$0xf]  ;;  %v2749_v63 = vor.u32 %v3561_v46, %v2748_v44  ;;  %v2414_v46 = vld [vmem:[#allocation2 + $0x78] sm:$0xf0] }
  0x71   :  { %1429 = vmatmul.bf16.vlgmr.msra.gmra.mxu3 %v3921_v34  ;;  %v3569_v16 = vld [vmem:[#allocation2 + $0x354] sm:$0xf0]  ;;  %v2669_v18 = vor.u32 %v3541_v10, %v2668_v9  ;;  %v3132_v61 = vld [vmem:[#allocation2 + $0x608] sm:$0xf]  ;;  %v3523_v9 = vld [vmem:[#allocation2 + $0x1ec] sm:$0xf] }
  0x72   :  { %1473 = vmatpush.bf16.msrb.mxu3 %v2605_v14  ;;  %1441 = vmatpush.bf16.msrb.mxu2 %v3001_v19  ;;  %v2397_v14 = vor.u32 %v3473_v8, %v2396_v4  ;;  %v2525_v19 = vor.u32 %v3505_v12, %v2524_v11  ;;  %v2781_v25 = vor.u32 %v3569_v16, %v2780_v15  ;;  %v3617_v59 = vld [vmem:[#allocation2 + $0x4d4] sm:$0xf0]  ;;  %v3487_v4 = vld [vmem:[#allocation2 + $0xcc] sm:$0xf]  ;;  %v2606_v10 = vld [vmem:[#allocation2 + $0x1f8] sm:$0xf0] }
  0x73   :  { %v3657_v62 = vld [vmem:[#allocation2 + $0x614] sm:$0xf0]  ;;  %v2956_v12 = vld [vmem:[#allocation2 + $0x4a8] sm:$0xf] }
  0x74   :  { %1461 = vmatpush.bf16.msrb.mxu1 %v2461_v23  ;;  %1486 = vmatpush.bf16.msra.mxu0 %v2733_v27  ;;  %v2508_v23 = vld [vmem:[#allocation2 + $0x128] sm:$0xf]  ;;  %v2381_v27 = vor.u32 %v3469_v20, %v2380_v17  ;;  %v3133_v8 = vor.u32 %v3657_v62, %v3132_v61  ;;  %v3645_v15 = vld [vmem:[#allocation2 + $0x5b4] sm:$0xf0]  ;;  %v3483_v17 = vld [vmem:[#allocation2 + $0xac] sm:$0xf] }
  0x75   :  { %1442 = vmatmul.bf16.vlgmr.msrb.gmra.mxu2 %v3923_v39  ;;  %v2509_v32 = vor.u32 %v3501_v24, %v2508_v23  ;;  %v2446_v20 = vld [vmem:[#allocation2 + $0xb8] sm:$0xf0]  ;;  %v2940_v24 = vld [vmem:[#allocation2 + $0x488] sm:$0xf]  ;;  %v3605_v38 = vld [vmem:[#allocation2 + $0x474] sm:$0xf0] }
  0x76   :  { %1499 = vmatpush.bf16.msra.mxu2 %v2861_v22  ;;  %1474 = vmatpush.bf16.msrb.mxu3 %v2589_v28  ;;  %v3537_v22 = vld [vmem:[#allocation2 + $0x254] sm:$0xf0]  ;;  %v2924_v37 = vld [vmem:[#allocation2 + $0x468] sm:$0xf]  ;;  %v2398_v62 = vld [vmem:[#allocation2 + $0x58] sm:$0xf0] }
  0x77   :  { %v3565_v28 = vld [vmem:[#allocation2 + $0x334] sm:$0xf0]  ;;  %v2653_v31 = vor.u32 %v3537_v22, %v2652_v21  ;;  %v3519_v21 = vld [vmem:[#allocation2 + $0x1cc] sm:$0xf]  ;;  %v2590_v22 = vld [vmem:[#allocation2 + $0x1d8] sm:$0xf0] }
  0x78   :  { %1462 = vmatpush.bf16.msrb.mxu1 %v2445_v36  ;;  %1487 = vmatpush.bf16.msra.mxu0 %v2717_v41  ;;  %v3533_v36 = vld [vmem:[#allocation2 + $0x234] sm:$0xf0]  ;;  %v2765_v41 = vor.u32 %v3565_v28, %v2764_v26  ;;  %v3068_v26 = vld [vmem:[#allocation2 + $0x588] sm:$0xf]  ;;  %v2449_v28 = vor.u32 %v3483_v17, %v2446_v20  ;;  %v2593_v30 = vor.u32 %v3519_v21, %v2590_v22  ;;  %v2734_v20 = vld [vmem:[#allocation2 + $0x2f8] sm:$0xf0] }
  0x79   :  { %v3052_v40 = vld [vmem:[#allocation2 + $0x568] sm:$0xf]  ;;  %v3587_v22 = vld [vmem:[#allocation2 + $0x3ec] sm:$0xf] }
  0x7a   :  { %1500 = vmatpush.bf16.msra.mxu2 %v2845_v35  ;;  %1475 = vmatpush.bf16.msrb.mxu3 %v2573_v42  ;;  %v2636_v35 = vld [vmem:[#allocation2 + $0x228] sm:$0xf] }
  0x7b   :  { %v3116_v42 = vld [vmem:[#allocation2 + $0x5e8] sm:$0xf]  ;;  %v2637_v47 = vor.u32 %v3533_v36, %v2636_v35  ;;  %v2574_v35 = vld [vmem:[#allocation2 + $0x1b8] sm:$0xf0] }
  0x7c   :  { %1463 = vmatpush.bf16.msrb.mxu1 %v2429_v50  ;;  %1488 = vmatpush.bf16.msra.mxu0 %v2701_v55  ;;  %v2478_v50 = vld [vmem:[#allocation2 + $0xf8] sm:$0xf0]  ;;  %v2620_v55 = vld [vmem:[#allocation2 + $0x208] sm:$0xf]  ;;  %v3117_v58 = vor.u32 %v3653_v43, %v3116_v42  ;;  %v3475_v43 = vld [vmem:[#allocation2 + $0x6c] sm:$0xf]  ;;  %v2577_v44 = vor.u32 %v3515_v33, %v2574_v35 }
  0x7d   :  { %v3004_v17 = vld [vmem:[#allocation2 + $0x508] sm:$0xf]  ;;  %v2718_v35 = vld [vmem:[#allocation2 + $0x2d8] sm:$0xf0] }
  0x7e   :  { %1501 = vmatpush.bf16.msra.mxu2 %v2829_v49  ;;  %1476 = vmatpush.bf16.msrb.mxu3 %v2557_v56  ;;  %v3491_v49 = vld [vmem:[#allocation2 + $0xec] sm:$0xf]  ;;  %v3529_v56 = vld [vmem:[#allocation2 + $0x214] sm:$0xf0] }
  0x7f   :  { %3139 = vmatmul.msk.bf16.vlgmr.msrb.gmra.mxu0 %vm1274_vm0, %v3914_v48  ;;  %v2481_v2 = vor.u32 %v3491_v49, %v2478_v50  ;;  %v2621_v3 = vor.u32 %v3529_v56, %v2620_v55  ;;  %v2558_v49 = vld [vmem:[#allocation2 + $0x198] sm:$0xf0]  ;;  %v3633_v55 = vld [vmem:[#allocation2 + $0x554] sm:$0xf0]  ;;  %v2417_v56 = vor.u32 %v3475_v43, %v2414_v46  ;;  %v3615_v43 = vld [vmem:[#allocation2 + $0x4cc] sm:$0xf] }
  0x80   :  { %1464 = vmatpush.bf16.msrb.mxu1 %v2413_v1  ;;  %1489 = vmatpush.bf16.msra.mxu0 %v2685_v5  ;;  %v3649_v1 = vld [vmem:[#allocation2 + $0x5d4] sm:$0xf0]  ;;  %v2973_v5 = vor.u32 %v3617_v59, %v2972_v54  ;;  %v3036_v54 = vld [vmem:[#allocation2 + $0x548] sm:$0xf]  ;;  %v2974_v46 = vld [vmem:[#allocation2 + $0x4d8] sm:$0xf0] }
  0x82   :  { %1502 = vmatpush.bf16.msra.mxu2 %v2813_v0  ;;  %1477 = vmatpush.bf16.msrb.mxu3 %v2541_v7  ;;  %v3100_v0 = vld [vmem:[#allocation2 + $0x5c8] sm:$0xf]  ;;  %v2462_v7 = vld [vmem:[#allocation2 + $0xd8] sm:$0xf0] }
  0x83   :  { %v3101_v11 = vor.u32 %v3649_v1, %v3100_v0  ;;  %v2465_v16 = vor.u32 %v3487_v4, %v2462_v7  ;;  %v2542_v0 = vld [vmem:[#allocation2 + $0x178] sm:$0xf0]  ;;  %v3037_v1 = vor.u32 %v3633_v55, %v3036_v54  ;;  %v3020_v4 = vld [vmem:[#allocation2 + $0x528] sm:$0xf] }
  0x84   :  { %1465 = vmatpush.bf16.msrb.mxu1 %v2397_v14  ;;  %1490 = vmatpush.bf16.msra.mxu0 %v2669_v18  ;;  %v3084_v14 = vld [vmem:[#allocation2 + $0x5a8] sm:$0xf]  ;;  %v2609_v18 = vor.u32 %v3523_v9, %v2606_v10  ;;  %v2494_v54 = vld [vmem:[#allocation2 + $0x118] sm:$0xf0] }
  0x85   :  { %v3085_v23 = vor.u32 %v3645_v15, %v3084_v14  ;;  %v2876_v15 = vld [vmem:[#allocation2 + $0x408] sm:$0xf]  ;;  %v2830_v55 = vld [vmem:[#allocation2 + $0x3b8] sm:$0xf0] }
  0x86   :  { %1503 = vmatpush.bf16.msra.mxu2 %v2797_v13  ;;  %1478 = vmatpush.bf16.msrb.mxu3 %v2525_v19  ;;  %v3613_v13 = vld [vmem:[#allocation2 + $0x4b4] sm:$0xf0] }
  0x87   :  { %v2957_v19 = vor.u32 %v3613_v13, %v2956_v12  ;;  %v3503_v12 = vld [vmem:[#allocation2 + $0x14c] sm:$0xf]  ;;  %v2526_v13 = vld [vmem:[#allocation2 + $0x158] sm:$0xf0] }
  0x88   :  { %1466 = vmatpush.bf16.msrb.mxu1 %v2381_v27  ;;  %1491 = vmatpush.bf16.msra.mxu0 %v2653_v31  ;;  %v3641_v27 = vld [vmem:[#allocation2 + $0x594] sm:$0xf0] }
  0x89   :  { %v3069_v36 = vor.u32 %v3641_v27, %v3068_v26  ;;  %v3463_v26 = vld [vmem:[#allocation2 + $0xc] sm:$0xf]  ;;  %v2366_v27 = vld [vmem:[#allocation2 + $0x18] sm:$0xf0] }
  0x8a   :  { %1504 = vmatpush.bf16.msra.mxu2 %v2781_v25  ;;  %1479 = vmatpush.bf16.msrb.mxu3 %v2509_v32  ;;  %v3609_v25 = vld [vmem:[#allocation2 + $0x494] sm:$0xf0]  ;;  %v2430_v32 = vld [vmem:[#allocation2 + $0x98] sm:$0xf0] }
  0x8b   :  { %v2941_v31 = vor.u32 %v3609_v25, %v2940_v24  ;;  %v2433_v42 = vor.u32 %v3479_v29, %v2430_v32  ;;  %v2529_v24 = vor.u32 %v3503_v12, %v2526_v13  ;;  %v3551_v32 = vld [vmem:[#allocation2 + $0x2cc] sm:$0xf]  ;;  %v2942_v13 = vld [vmem:[#allocation2 + $0x498] sm:$0xf0] }
  0x8c   :  { %1467 = vmatpush.bf16.msrb.mxu1 %v2365_v45  ;;  %1492 = vmatpush.bf16.msra.mxu0 %v2637_v47  ;;  %v2925_v45 = vor.u32 %v3605_v38, %v2924_v37  ;;  %v3511_v47 = vld [vmem:[#allocation2 + $0x18c] sm:$0xf]  ;;  %v2510_v37 = vld [vmem:[#allocation2 + $0x138] sm:$0xf0]  ;;  %v2369_v38 = vor.u32 %v3463_v26, %v2366_v27 }
  0x8d   :  { %v2561_v59 = vor.u32 %v3511_v47, %v2558_v49  ;;  %v3547_v47 = vld [vmem:[#allocation2 + $0x2ac] sm:$0xf]  ;;  %v2702_v49 = vld [vmem:[#allocation2 + $0x2b8] sm:$0xf0] }
  0x8e   :  { %1505 = vmatpush.bf16.msra.mxu2 %v2765_v41  ;;  %1480 = vmatpush.bf16.msrb.mxu3 %v2493_v51  ;;  %v3637_v41 = vld [vmem:[#allocation2 + $0x574] sm:$0xf0]  ;;  %v2908_v51 = vld [vmem:[#allocation2 + $0x448] sm:$0xf]  ;;  %v3607_v12 = vld [vmem:[#allocation2 + $0x48c] sm:$0xf] }
  0x8f   :  { %1468 = vmatmul.bf16.vlgmr.msrb.gmra.mxu1 %v3901_v57  ;;  %v3053_v50 = vor.u32 %v3637_v41, %v3052_v40  ;;  %v3583_v40 = vld [vmem:[#allocation2 + $0x3cc] sm:$0xf]  ;;  %v2846_v41 = vld [vmem:[#allocation2 + $0x3d8] sm:$0xf0] }
  0x90   :  { %1512 = vmatpush.bf16.msra.mxu1 %v2989_v52  ;;  %1493 = vmatpush.bf16.msra.mxu0 %v2621_v3  ;;  %v3601_v52 = vld [vmem:[#allocation2 + $0x454] sm:$0xf0] }
  0x91   :  { %1481 = vmatmul.bf16.vlgmr.msrb.gmra.mxu3 %v3907_v6  ;;  %v2909_v61 = vor.u32 %v3601_v52, %v2908_v51  ;;  %v3597_v3 = vld [vmem:[#allocation2 + $0x434] sm:$0xf0]  ;;  %v3579_v51 = vld [vmem:[#allocation2 + $0x3ac] sm:$0xf] }
  0x92   :  { %1525 = vmatpush.bf16.msra.mxu3 %v3117_v58  ;;  %1506 = vmatpush.bf16.msra.mxu2 %v2749_v63  ;;  %v3471_v58 = vld [vmem:[#allocation2 + $0x4c] sm:$0xf] }
  0x93   :  { %1494 = vmatmul.bf16.vlgmr.msra.gmra.mxu0 %v3899_v53  ;;  %v3507_v63 = vld [vmem:[#allocation2 + $0x16c] sm:$0xf]  ;;  %v2401_v7 = vor.u32 %v3471_v58, %v2398_v62  ;;  %v3118_v58 = vld [vmem:[#allocation2 + $0x5f8] sm:$0xf0] }
  0x94   :  { %1513 = vmatpush.bf16.msra.mxu1 %v2973_v5  ;;  %1545 = vmatpush.bf16.msrb.mxu0 %v3133_v8  ;;  %v3629_v5 = vld [vmem:[#allocation2 + $0x534] sm:$0xf0]  ;;  %v3467_v8 = vld [vmem:[#allocation2 + $0x2c] sm:$0xf]  ;;  %v2545_v9 = vor.u32 %v3507_v63, %v2542_v0  ;;  %v2958_v0 = vld [vmem:[#allocation2 + $0x4b8] sm:$0xf0] }
  0x95   :  { %1507 = vmatmul.bf16.vlgmr.msra.gmra.mxu2 %v3903_v60  ;;  %v3021_v14 = vor.u32 %v3629_v5, %v3020_v4  ;;  %v3495_v52 = vld [vmem:[#allocation2 + $0x10c] sm:$0xf]  ;;  %v2686_v4 = vld [vmem:[#allocation2 + $0x298] sm:$0xf0] }
  0x96   :  { %1551 = vmatpush.bf16.msrb.mxu2 %v2481_v2  ;;  %1526 = vmatpush.bf16.msra.mxu3 %v3101_v11  ;;  %v2892_v2 = vld [vmem:[#allocation2 + $0x428] sm:$0xf]  ;;  %v2382_v11 = vld [vmem:[#allocation2 + $0x38] sm:$0xf0]  ;;  %v2497_v62 = vor.u32 %v3495_v52, %v2494_v54  ;;  %v3611_v63 = vld [vmem:[#allocation2 + $0x4ac] sm:$0xf] }
  0x97   :  { %v2893_v10 = vor.u32 %v3597_v3, %v2892_v2  ;;  %v2385_v21 = vor.u32 %v3467_v8, %v2382_v11  ;;  %v3543_v3 = vld [vmem:[#allocation2 + $0x28c] sm:$0xf] }
  0x98   :  { %1564 = vmatpush.bf16.msra.mxu0 %v2609_v18  ;;  %1514 = vmatpush.bf16.msra.mxu1 %v2957_v19  ;;  %v3625_v18 = vld [vmem:[#allocation2 + $0x514] sm:$0xf0]  ;;  %v3555_v19 = vld [vmem:[#allocation2 + $0x2ec] sm:$0xf]  ;;  %v2689_v11 = vor.u32 %v3543_v3, %v2686_v4  ;;  %v3038_v4 = vld [vmem:[#allocation2 + $0x558] sm:$0xf0] }
  0x99   :  { %v2737_v29 = vor.u32 %v3555_v19, %v2734_v20  ;;  %v3575_v5 = vld [vmem:[#allocation2 + $0x38c] sm:$0xf]  ;;  %v2798_v19 = vld [vmem:[#allocation2 + $0x378] sm:$0xf0] }
  0x9a   :  { %1552 = vmatpush.bf16.msrb.mxu2 %v2465_v16  ;;  %1527 = vmatpush.bf16.msra.mxu3 %v3085_v23  ;;  %v3593_v16 = vld [vmem:[#allocation2 + $0x414] sm:$0xf0]  ;;  %v2862_v23 = vld [vmem:[#allocation2 + $0x3f8] sm:$0xf0]  ;;  %v3647_v8 = vld [vmem:[#allocation2 + $0x5cc] sm:$0xf] }
  0x9b   :  { %v2877_v25 = vor.u32 %v3593_v16, %v2876_v15  ;;  %v2865_v33 = vor.u32 %v3587_v22, %v2862_v23  ;;  %v3539_v16 = vld [vmem:[#allocation2 + $0x26c] sm:$0xf]  ;;  %v2945_v22 = vor.u32 %v3607_v12, %v2942_v13  ;;  %v2878_v13 = vld [vmem:[#allocation2 + $0x418] sm:$0xf0] }
  0x9c   :  { %1565 = vmatpush.bf16.msra.mxu0 %v2593_v30  ;;  %1515 = vmatpush.bf16.msra.mxu1 %v2941_v31  ;;  %v3619_v30 = vld [vmem:[#allocation2 + $0x4ec] sm:$0xf]  ;;  %v2990_v31 = vld [vmem:[#allocation2 + $0x4f8] sm:$0xf0] }
  0x9d   :  { %v3643_v20 = vld [vmem:[#allocation2 + $0x5ac] sm:$0xf] }
  0x9e   :  { %1553 = vmatpush.bf16.msrb.mxu2 %v2449_v28  ;;  %1528 = vmatpush.bf16.msra.mxu3 %v3069_v36  ;;  %v3005_v28 = vor.u32 %v3625_v18, %v3004_v17  ;;  %v3499_v36 = vld [vmem:[#allocation2 + $0x12c] sm:$0xf] }
  0x9f   :  { %v3571_v17 = vld [vmem:[#allocation2 + $0x36c] sm:$0xf] }
  0xa0   :  { %1566 = vmatpush.bf16.msra.mxu0 %v2577_v44  ;;  %1516 = vmatpush.bf16.msra.mxu1 %v2925_v45  ;;  %v2721_v44 = vor.u32 %v3551_v32, %v2718_v35  ;;  %v2513_v45 = vor.u32 %v3499_v36, %v2510_v37  ;;  %v2801_v26 = vor.u32 %v3571_v17, %v2798_v19  ;;  %v2782_v32 = vld [vmem:[#allocation2 + $0x358] sm:$0xf0]  ;;  %v3631_v3 = vld [vmem:[#allocation2 + $0x54c] sm:$0xf]  ;;  %v3264_v19 = vld [vmem:[#allocation5 + $0xf0] sm:$0xf] }
  0xa1   :  { %v3070_v35 = vld [vmem:[#allocation2 + $0x598] sm:$0xf0]  ;;  %v3591_v12 = vld [vmem:[#allocation2 + $0x40c] sm:$0xf] }
  0xa2   :  { %1554 = vmatpush.bf16.msrb.mxu2 %v2433_v42  ;;  %1529 = vmatpush.bf16.msra.mxu3 %v3053_v50  ;;  %v2993_v42 = vor.u32 %v3619_v30, %v2990_v31  ;;  %v2849_v50 = vor.u32 %v3583_v40, %v2846_v41  ;;  %v3567_v30 = vld [vmem:[#allocation2 + $0x34c] sm:$0xf]  ;;  %v2910_v41 = vld [vmem:[#allocation2 + $0x458] sm:$0xf0] }
  0xa3   :  { %3140 = vmatmul.msk.bf16.vlgmr.msrb.gmra.mxu0 %vm1274_vm0, %v3914_v48  ;;  %v3599_v40 = vld [vmem:[#allocation2 + $0x44c] sm:$0xf] }
  0xa4   :  { %1567 = vmatpush.bf16.msra.mxu0 %v2561_v59  ;;  %1517 = vmatpush.bf16.msra.mxu1 %v2909_v61  ;;  %v2977_v59 = vor.u32 %v3615_v43, %v2974_v46  ;;  %v2705_v61 = vor.u32 %v3547_v47, %v2702_v49  ;;  %v2785_v43 = vor.u32 %v3567_v30, %v2782_v32  ;;  %v2638_v46 = vld [vmem:[#allocation2 + $0x238] sm:$0xf0]  ;;  %v3563_v47 = vld [vmem:[#allocation2 + $0x32c] sm:$0xf]  ;;  %v3256_v32 = vld [vmem:[#allocation5 + $0xe0] sm:$0xf] }
  0xa5   :  { %v2766_v49 = vld [vmem:[#allocation2 + $0x338] sm:$0xf0]  ;;  %v2913_v54 = vor.u32 %v3599_v40, %v2910_v41  ;;  %v3184_v40 = vld [vmem:[#allocation5 + $0x50] sm:$0xf]  ;;  %v3669_v41 = vld [vmem:[#allocation5 + $0x54] sm:$0xf0] }
  0xa6   :  { %1555 = vmatpush.bf16.msrb.mxu2 %v2417_v56  ;;  %1530 = vmatpush.bf16.msra.mxu3 %v3037_v1  ;;  %v3651_v56 = vld [vmem:[#allocation2 + $0x5ec] sm:$0xf]  ;;  %v2833_v1 = vor.u32 %v3579_v51, %v2830_v55  ;;  %v3054_v51 = vld [vmem:[#allocation2 + $0x578] sm:$0xf0] }
  0xa7   :  { %v3121_v2 = vor.u32 %v3651_v56, %v3118_v58  ;;  %v3595_v58 = vld [vmem:[#allocation2 + $0x42c] sm:$0xf] }
  0xa8   :  { %1568 = vmatpush.bf16.msra.mxu0 %v2545_v9  ;;  %1518 = vmatpush.bf16.msra.mxu1 %v2893_v10  ;;  %v3102_v9 = vld [vmem:[#allocation2 + $0x5d8] sm:$0xf0]  ;;  %v2961_v10 = vor.u32 %v3611_v63, %v2958_v0  ;;  %v3527_v63 = vld [vmem:[#allocation2 + $0x20c] sm:$0xf] }
  0xa9   :  { %v3105_v15 = vor.u32 %v3647_v8, %v3102_v9  ;;  %v2622_v0 = vld [vmem:[#allocation2 + $0x218] sm:$0xf0]  ;;  %v3200_v8 = vld [vmem:[#allocation5 + $0x70] sm:$0xf]  ;;  %v3673_v9 = vld [vmem:[#allocation5 + $0x74] sm:$0xf0] }
  0xaa   :  { %1556 = vmatpush.bf16.msrb.mxu2 %v2401_v7  ;;  %1531 = vmatpush.bf16.msra.mxu3 %v3021_v14  ;;  %v2814_v7 = vld [vmem:[#allocation2 + $0x398] sm:$0xf0] }
  0xab   :  { %v2817_v14 = vor.u32 %v3575_v5, %v2814_v7 }
  0xac   :  { %1569 = vmatpush.bf16.msra.mxu0 %v2529_v24  ;;  %1519 = vmatpush.bf16.msra.mxu1 %v2877_v25  ;;  %v3603_v24 = vld [vmem:[#allocation2 + $0x46c] sm:$0xf]  ;;  %v2926_v25 = vld [vmem:[#allocation2 + $0x478] sm:$0xf0] }
  0xad   :  { %v2929_v36 = vor.u32 %v3603_v24, %v2926_v25  ;;  %v3022_v24 = vld [vmem:[#allocation2 + $0x538] sm:$0xf0] }
  0xae   :  { %1557 = vmatpush.bf16.msrb.mxu2 %v2385_v21  ;;  %1532 = vmatpush.bf16.msra.mxu3 %v3005_v28  ;;  %v3086_v21 = vld [vmem:[#allocation2 + $0x5b8] sm:$0xf0]  ;;  %v3535_v28 = vld [vmem:[#allocation2 + $0x24c] sm:$0xf] }
  0xaf   :  { %1520 = vmatmul.bf16.vlgmr.msra.gmra.mxu1 %v3921_v34  ;;  %v3089_v27 = vor.u32 %v3643_v20, %v3086_v21  ;;  %v3689_v20 = vld [vmem:[#allocation5 + $0xf4] sm:$0xf0] }
  0xb0   :  { %1577 = vmatpush.bf16.msrb.mxu1 %v2737_v29  ;;  %1570 = vmatpush.bf16.msra.mxu0 %v2513_v45  ;;  %v3944_v18 = vpop.f32.mrf.mxu0  ;;  %v2654_v29 = vld [vmem:[#allocation2 + $0x258] sm:$0xf0]  ;;  %v3947_v31 = vpop.f32.mrf.mxu1  ;;  %v3531_v45 = vld [vmem:[#allocation2 + $0x22c] sm:$0xf]  ;;  %v3265_v25 = vor.u32 %v3689_v20, %v3264_v19  ;;  %v3144_v20 = vld [vmem:[#allocation5] sm:$0xf] }
  0xb1   :  { %1533 = vmatmul.bf16.vlgmr.msra.gmra.mxu3 %v3923_v39  ;;  %v2641_v56 = vor.u32 %v3531_v45, %v2638_v46  ;;  %v3248_v46 = vld [vmem:[#allocation5 + $0xd0] sm:$0xf] }
  0xb2   :  { %1590 = vmatpush.bf16.msrb.mxu3 %v2865_v33  ;;  %1558 = vmatpush.bf16.msrb.mxu2 %v2369_v38  ;;  %v3639_v33 = vld [vmem:[#allocation2 + $0x58c] sm:$0xf]  ;;  %v2657_v38 = vor.u32 %v3535_v28, %v2654_v29  ;;  %v3671_v28 = vld [vmem:[#allocation5 + $0x64] sm:$0xf0] }
  0xb3   :  { %v3954_v37 = vpop.f32.mrf.mxu2 }
  0xb4   :  { %1578 = vmatpush.bf16.msrb.mxu1 %v2721_v44  ;;  %1571 = vmatpush.bf16.msra.mxu0 %v2497_v62  ;;  %v3073_v44 = vor.u32 %v3639_v33, %v3070_v35  ;;  %v3687_v33 = vld [vmem:[#allocation5 + $0xe4] sm:$0xf0] }
  0xb5   :  { %1559 = vmatmul.bf16.vlgmr.msrb.gmra.mxu2 %v3901_v57  ;;  %v2670_v57 = vld [vmem:[#allocation2 + $0x278] sm:$0xf0] }
  0xb6   :  { %1603 = vmatpush.bf16.msra.mxu2 %v2993_v42  ;;  %1591 = vmatpush.bf16.msrb.mxu3 %v2849_v50  ;;  %v2673_v23 = vor.u32 %v3539_v16, %v2670_v57  ;;  %v3956_v42 = vpop.f32.mrf.mxu3  ;;  %v3635_v50 = vld [vmem:[#allocation2 + $0x56c] sm:$0xf]  ;;  %v3041_v16 = vor.u32 %v3631_v3, %v3038_v4  ;;  %v3134_v57 = vld [vmem:[#allocation2 + $0x618] sm:$0xf0]  ;;  %v3160_v3 = vld [vmem:[#allocation5 + $0x20] sm:$0xf] }
  0xb7   :  { %1572 = vmatmul.bf16.vlgmr.msra.gmra.mxu0 %v3907_v6  ;;  %v3952_v6 = vld [vmem:[%s4035_s2] sm:$0xf]  ;;  %v3057_v62 = vor.u32 %v3635_v50, %v3054_v51  ;;  %v3663_v4 = vld [vmem:[#allocation5 + $0x24] sm:$0xf0] }
  0xb8   :  { %1579 = vmatpush.bf16.msrb.mxu1 %v2705_v61  ;;  %1616 = vmatpush.bf16.msrb.mxu0 %v3121_v2  ;;  %v1289_v52 = vpop.f32.mrf.mxu0  ;;  %v262_v55 = vperm.slane %v3952_v6, 0  ;;  %v2769_v61 = vor.u32 %v3563_v47, %v2766_v49  ;;  %v2750_v2 = vld [vmem:[#allocation2 + $0x318] sm:$0xf0]  ;;  %v1302_v5 = vpop.f32.mrf.mxu1  ;;  %v3685_v47 = vld [vmem:[#allocation5 + $0xd4] sm:$0xf0]  ;;  %v3185_v49 = vor.u32 %v3669_v41, %v3184_v40 }
  0xb9   :  { %v3176_v50 = vld [vmem:[#allocation5 + $0x40] sm:$0xf]  ;;  %v3249_v51 = vor.u32 %v3685_v47, %v3248_v46 }
  0xba   :  { %1604 = vmatpush.bf16.msra.mxu2 %v2977_v59  ;;  %1592 = vmatpush.bf16.msrb.mxu3 %v2833_v1  ;;  %v2894_v59 = vld [vmem:[#allocation2 + $0x438] sm:$0xf0]  ;;  %v3559_v1 = vld [vmem:[#allocation2 + $0x30c] sm:$0xf]  ;;  %v1288_v21 = vadd.f32 %v3944_v18, %v262_v55  ;;  %v3240_v52 = vld [vmem:[#allocation5 + $0xc0] sm:$0xf] }
  0xbb   :  { %v2897_v7 = vor.u32 %v3595_v58, %v2894_v59  ;;  %v3623_v18 = vld [vmem:[#allocation2 + $0x50c] sm:$0xf]  ;;  %v3168_v58 = vld [vmem:[#allocation5 + $0x30] sm:$0xf]  ;;  %v3665_v59 = vld [vmem:[#allocation5 + $0x34] sm:$0xf0] }
  0xbc   :  { %1580 = vmatpush.bf16.msrb.mxu1 %v2689_v11  ;;  %1617 = vmatpush.bf16.msrb.mxu0 %v3105_v15  ;;  %v2625_v11 = vor.u32 %v3527_v63, %v2622_v0  ;;  %v2753_v15 = vor.u32 %v3559_v1, %v2750_v2  ;;  %v1301_v35 = vadd.f32 %v3947_v31, %v1288_v21  ;;  %v3232_v63 = vld [vmem:[#allocation5 + $0xb0] sm:$0xf]  ;;  %v3681_v0 = vld [vmem:[#allocation5 + $0xb4] sm:$0xf0]  ;;  %v3659_v21 = vld [vmem:[#allocation5 + $0x4] sm:$0xf0] }
  0xbd   :  { %v3169_v2 = vor.u32 %v3665_v59, %v3168_v58  ;;  %v3682_v59 = vld [vmem:[#allocation5 + $0xc4] sm:$0xf] }
  0xbe   :  { %1605 = vmatpush.bf16.msra.mxu2 %v2961_v10  ;;  %1593 = vmatpush.bf16.msrb.mxu3 %v2817_v14  ;;  %v1315_v10 = vpop.f32.mrf.mxu2  ;;  %v3655_v14 = vld [vmem:[#allocation2 + $0x60c] sm:$0xf]  ;;  %v1328_v17 = vpop.f32.mrf.mxu3  ;;  %v1314_v31 = vadd.f32 %v3954_v37, %v1301_v35 }
  0xbf   :  { %v3137_v29 = vor.u32 %v3655_v14, %v3134_v57  ;;  %v3161_v10 = vor.u32 %v3663_v4, %v3160_v3  ;;  %v3216_v57 = vld [vmem:[#allocation5 + $0x90] sm:$0xf]  ;;  %v3677_v17 = vld [vmem:[#allocation5 + $0x94] sm:$0xf0]  ;;  %v3234_v3 = vld [vmem:[#allocation5 + $0xb8] sm:$0xf0] }
  0xc0   :  { %1581 = vmatpush.bf16.msrb.mxu1 %v2673_v23  ;;  %1618 = vmatpush.bf16.msrb.mxu0 %v3089_v27  ;;  %v3627_v23 = vld [vmem:[#allocation2 + $0x52c] sm:$0xf]  ;;  %v3192_v27 = vld [vmem:[#allocation5 + $0x60] sm:$0xf] }
  0xc1   :  { %v3025_v30 = vor.u32 %v3627_v23, %v3022_v24  ;;  %v3672_v23 = vld [vmem:[#allocation5 + $0x74] sm:$0xf]  ;;  %v3202_v24 = vld [vmem:[#allocation5 + $0x78] sm:$0xf0] }
  0xc2   :  { %1606 = vmatpush.bf16.msra.mxu2 %v2945_v22  ;;  %1594 = vmatpush.bf16.msrb.mxu3 %v2801_v26  ;;  %v3201_v22 = vor.u32 %v3673_v9, %v3200_v8  ;;  %v2881_v26 = vor.u32 %v3591_v12, %v2878_v13  ;;  %v3679_v8 = vld [vmem:[#allocation5 + $0xa4] sm:$0xf0]  ;;  %v3661_v12 = vld [vmem:[#allocation5 + $0x14] sm:$0xf0] }
  0xc4   :  { %1582 = vmatpush.bf16.msrb.mxu1 %v2657_v38  ;;  %1619 = vmatpush.bf16.msrb.mxu0 %v3073_v44  ;;  %v3006_v38 = vld [vmem:[#allocation2 + $0x518] sm:$0xf0] }
  0xc5   :  { %v3009_v45 = vor.u32 %v3623_v18, %v3006_v38  ;;  %v3194_v18 = vld [vmem:[#allocation5 + $0x68] sm:$0xf0] }
  0xc6   :  { %1607 = vmatpush.bf16.msra.mxu2 %v2929_v36  ;;  %1595 = vmatpush.bf16.msrb.mxu3 %v2785_v43  ;;  %v3193_v36 = vor.u32 %v3671_v28, %v3192_v27  ;;  %v3257_v43 = vor.u32 %v3687_v33, %v3256_v32  ;;  %v1365_v44 = vpop.f32.mrf.mxu2  ;;  %v3145_v28 = vor.u32 %v3659_v21, %v3144_v20  ;;  %v3154_v20 = vld [vmem:[#allocation5 + $0x18] sm:$0xf0] }
  0xc7   :  { %v3205_v33 = vor.u32 %v3672_v23, %v3202_v24  ;;  %v3218_v24 = vld [vmem:[#allocation5 + $0x98] sm:$0xf0] }
  0xc8   :  { %1583 = vmatpush.bf16.msrb.mxu1 %v2641_v56  ;;  %1620 = vmatpush.bf16.msrb.mxu0 %v3057_v62 }
  0xca   :  { %1608 = vmatpush.bf16.msra.mxu2 %v2913_v54  ;;  %1596 = vmatpush.bf16.msrb.mxu3 %v2769_v61  ;;  %v3683_v54 = vld [vmem:[#allocation5 + $0xc4] sm:$0xf0] }
  0xcb   :  { %v3241_v37 = vor.u32 %v3683_v54, %v3240_v52  ;;  %v3250_v52 = vld [vmem:[#allocation5 + $0xd8] sm:$0xf0] }
  0xcc   :  { %1584 = vmatpush.bf16.msrb.mxu1 %v2625_v11  ;;  %1621 = vmatpush.bf16.msrb.mxu0 %v3041_v16  ;;  %v1339_v56 = vpop.f32.mrf.mxu0  ;;  %v1352_v62 = vpop.f32.mrf.mxu1  ;;  %v3152_v11 = vld [vmem:[#allocation5 + $0x10] sm:$0xf] }
  0xcd   :  { %v3153_v19 = vor.u32 %v3661_v12, %v3152_v11  ;;  %v3226_v12 = vld [vmem:[#allocation5 + $0xa8] sm:$0xf0] }
  0xce   :  { %1609 = vmatpush.bf16.msra.mxu2 %v2897_v7  ;;  %1597 = vmatpush.bf16.msrb.mxu3 %v2753_v15  ;;  %v3224_v7 = vld [vmem:[#allocation5 + $0xa0] sm:$0xf] }
  0xcf   :  { %1585 = vmatmul.bf16.vlgmr.msrb.gmra.mxu1 %v3899_v53  ;;  %v3667_v53 = vld [vmem:[#allocation5 + $0x44] sm:$0xf0]  ;;  %v3225_v14 = vor.u32 %v3679_v8, %v3224_v7  ;;  %v3162_v7 = vld [vmem:[#allocation5 + $0x28] sm:$0xf0] }
  0xd0   :  { %2065 = vmatpush.bf16.msra.mxu1 %v3265_v25  ;;  %1622 = vmatpush.bf16.msrb.mxu0 %v3025_v30  ;;  %v3177_v55 = vor.u32 %v3667_v53, %v3176_v50  ;;  %v3208_v25 = vld [vmem:[#allocation5 + $0x80] sm:$0xf]  ;;  %v3266_v30 = vld [vmem:[#allocation5 + $0xf8] sm:$0xf0] }
  0xd1   :  { %1598 = vmatmul.bf16.vlgmr.msrb.gmra.mxu3 %v3903_v60  ;;  %v1327_v60 = vadd.f32 %v3956_v42, %v1314_v31  ;;  %v3233_v42 = vor.u32 %v3681_v0, %v3232_v63  ;;  %v3668_v31 = vld [vmem:[#allocation5 + $0x54] sm:$0xf] }
  0xd2   :  { %2052 = vmatpush.bf16.msra.mxu3 %v3201_v22  ;;  %1610 = vmatpush.bf16.msra.mxu2 %v2881_v26  ;;  %v3217_v22 = vor.u32 %v3677_v17, %v3216_v57  ;;  %v3675_v26 = vld [vmem:[#allocation5 + $0x84] sm:$0xf0] }
  0xd3   :  { %v1340_v61 = vadd.f32 %v1339_v56, %v1327_v60  ;;  %v3666_v60 = vld [vmem:[#allocation5 + $0x44] sm:$0xf] }
  0xd4   :  { %2066 = vmatpush.bf16.msra.mxu1 %v3257_v43  ;;  %1623 = vmatpush.bf16.msrb.mxu0 %v3009_v45  ;;  %v1341_v13 = vpop.f32.mrf.mxu0  ;;  %v1354_v15 = vpop.f32.mrf.mxu1  ;;  %v263_v43 = vperm.slane %v3952_v6, 1  ;;  %v3258_v45 = vld [vmem:[#allocation5 + $0xe8] sm:$0xf0] }
  0xd5   :  { %1611 = vmatmul.bf16.vlgmr.msra.gmra.mxu2 %v3921_v34  ;;  %v1367_v34 = vpop.f32.mrf.mxu2  ;;  %v1353_v1 = vadd.f32 %v1352_v62, %v1340_v61  ;;  %v3664_v62 = vld [vmem:[#allocation5 + $0x34] sm:$0xf] }
  0xd6   :  { %1636 = vmatpush.bf16.msrb.mxu2 %v3137_v29  ;;  %2053 = vmatpush.bf16.msra.mxu3 %v3193_v36  ;;  %v3688_v29 = vld [vmem:[#allocation5 + $0xf4] sm:$0xf]  ;;  %v3209_v36 = vor.u32 %v3675_v26, %v3208_v25  ;;  %v3170_v34 = vld [vmem:[#allocation5 + $0x38] sm:$0xf0]  ;;  %v3312_v25 = vld [vmem:[#allocation5 + $0x150] sm:$0xf] }
  0xd7   :  { %1624 = vmatmul.bf16.vlgmr.msrb.gmra.mxu0 %v3923_v39  ;;  %v1366_v5 = vadd.f32 %v1365_v44, %v1353_v1  ;;  %v1378_v39 = vpop.f32.mrf.mxu3  ;;  %v3269_v38 = vor.u32 %v3688_v29, %v3266_v30  ;;  %v3686_v44 = vld [vmem:[#allocation5 + $0xe4] sm:$0xf]  ;;  %v3173_v4 = vor.u32 %v3664_v62, %v3170_v34  ;;  %v3701_v26 = vld [vmem:[#allocation5 + $0x154] sm:$0xf0]  ;;  %v3280_v34 = vld [vmem:[#allocation5 + $0x110] sm:$0xf] }
  0xd8   :  { %2067 = vmatpush.bf16.msra.mxu1 %v3249_v51  ;;  %v3261_v50 = vor.u32 %v3686_v44, %v3258_v45  ;;  %v1379_v53 = vadd.f32 %v1378_v39, %v263_v43  ;;  %v3684_v51 = vld [vmem:[#allocation5 + $0xd4] sm:$0xf]  ;;  %v3320_v39 = vld [vmem:[#allocation5 + $0x160] sm:$0xf]  ;;  %v3313_v30 = vor.u32 %v3701_v26, %v3312_v25  ;;  %v3298_v26 = vld [vmem:[#allocation5 + $0x138] sm:$0xf0] }
  0xd9   :  { %v1642_v9 = vmul.f32 0.5, %v1366_v5  ;;  %v3253_v56 = vor.u32 %v3684_v51, %v3250_v52  ;;  %v3328_v5 = vld [vmem:[#allocation5 + $0x170] sm:$0xf]  ;;  %v3697_v52 = vld [vmem:[#allocation5 + $0x134] sm:$0xf0] }
  0xda   :  { %2054 = vmatpush.bf16.msra.mxu3 %v3185_v49  ;;  %v3186_v49 = vld [vmem:[#allocation5 + $0x58] sm:$0xf0]  ;;  %v3696_v25 = vld [vmem:[#allocation5 + $0x134] sm:$0xf] }
  0xdb   :  { %3746 = vtanh.f32 %v1642_v9  ;;  %v3189_v54 = vor.u32 %v3668_v31, %v3186_v49  ;;  %v3678_v9 = vld [vmem:[#allocation5 + $0xa4] sm:$0xf]  ;;  %v3304_v31 = vld [vmem:[#allocation5 + $0x140] sm:$0xf]  ;;  %v3699_v49 = vld [vmem:[#allocation5 + $0x144] sm:$0xf0] }
  0xdc   :  { %2068 = vmatpush.bf16.msra.mxu1 %v3241_v37  ;;  %v3242_v37 = vld [vmem:[#allocation5 + $0xc8] sm:$0xf0]  ;;  %v3229_v21 = vor.u32 %v3678_v9, %v3226_v12  ;;  %v3305_v51 = vor.u32 %v3699_v49, %v3304_v31  ;;  %v3376_v31 = vld [vmem:[#allocation5 + $0x1d0] sm:$0xf]  ;;  %v3717_v49 = vld [vmem:[#allocation5 + $0x1d4] sm:$0xf0] }
  0xdd   :  { %v1391_v16 = vpop.f32.mrf.mxu2  ;;  %v3245_v63 = vor.u32 %v3682_v59, %v3242_v37  ;;  %v3322_v12 = vld [vmem:[#allocation5 + $0x168] sm:$0xf0] }
  0xde   :  { %2055 = vmatpush.bf16.msra.mxu3 %v3177_v55  ;;  %v3178_v55 = vld [vmem:[#allocation5 + $0x48] sm:$0xf0]  ;;  %v1392_v58 = vadd.f32 %v1391_v16, %v1379_v53 }
  0xdf   :  { %v1380_v35 = vpop.f32.mrf.mxu3  ;;  %v3181_v61 = vor.u32 %v3666_v60, %v3178_v55  ;;  %v3288_v55 = vld [vmem:[#allocation5 + $0x120] sm:$0xf] }
  0xe0   :  { %2069 = vmatpush.bf16.msra.mxu1 %v3233_v42  ;;  %v3662_v42 = vld [vmem:[#allocation5 + $0x24] sm:$0xf] }
  0xe1   :  { %v3747_v27 = vpop.eup %3746  ;;  %v3165_v16 = vor.u32 %v3662_v42, %v3162_v7  ;;  %v3704_v42 = vld [vmem:[#allocation5 + $0x174] sm:$0xf] }
  0xe2   :  { %2056 = vmatpush.bf16.msra.mxu3 %v3169_v2  ;;  %v1650_v32 = vmul.f32 0.5, %v3747_v27  ;;  %v3680_v2 = vld [vmem:[#allocation5 + $0xb4] sm:$0xf] }
  0xe3   :  { %v3237_v8 = vor.u32 %v3680_v2, %v3234_v3  ;;  %v3691_v3 = vld [vmem:[#allocation5 + $0x104] sm:$0xf0] }
  0xe4   :  { %2070 = vmatpush.bf16.msra.mxu1 %v3225_v14  ;;  %v1654_v40 = vadd.f32 0.5, %v1650_v32  ;;  %v3703_v14 = vld [vmem:[#allocation5 + $0x164] sm:$0xf0]  ;;  %v3658_v32 = vld [vmem:[#allocation5 + $0x4] sm:$0xf] }
  0xe5   :  { %3141 = vmatmul.msk.bf16.vlgmr.msrb.gmra.mxu2 %vm1274_vm0, %v3914_v48  ;;  %v3670_v48 = vld [vmem:[#allocation5 + $0x64] sm:$0xf]  ;;  %v1393_v41 = vpop.f32.mrf.mxu2  ;;  %v3321_v57 = vor.u32 %v3703_v14, %v3320_v39  ;;  %v3700_v14 = vld [vmem:[#allocation5 + $0x154] sm:$0xf] }
  0xe6   :  { %2057 = vmatpush.bf16.msra.mxu3 %v3161_v10  ;;  %v3970_v46 = vpack.c.bf16 %v1654_v40, %v1654_v40  ;;  %v3197_v47 = vor.u32 %v3670_v48, %v3194_v18  ;;  %v3705_v10 = vld [vmem:[#allocation5 + $0x174] sm:$0xf0]  ;;  %v3674_v48 = vld [vmem:[#allocation5 + $0x84] sm:$0xf]  ;;  %v3210_v18 = vld [vmem:[#allocation5 + $0x88] sm:$0xf0] }
  0xe7   :  { %v3329_v13 = vor.u32 %v3705_v10, %v3328_v5  ;;  %v3213_v43 = vor.u32 %v3674_v48, %v3210_v18  ;;  %v3330_v5 = vld [vmem:[#allocation5 + $0x178] sm:$0xf0]  ;;  %v3384_v48 = vld [vmem:[#allocation5 + $0x1e0] sm:$0xf]  ;;  %v3719_v18 = vld [vmem:[#allocation5 + $0x1e4] sm:$0xf0] }
  0xe8   :  { %2071 = vmatpush.bf16.msra.mxu1 %v3217_v22  ;;  %v3676_v22 = vld [vmem:[#allocation5 + $0x94] sm:$0xf]  ;;  %v3333_v7 = vor.u32 %v3704_v42, %v3330_v5  ;;  %v3344_v42 = vld [vmem:[#allocation5 + $0x190] sm:$0xf] }
  0xe9   :  { %2078 = vmatpush.bf16.msra.mxu2 %v3329_v13  ;;  %v3221_v35 = vor.u32 %v3676_v22, %v3218_v24 }
  0xea   :  { %2058 = vmatpush.bf16.msra.mxu3 %v3153_v19  ;;  %v3660_v19 = vld [vmem:[#allocation5 + $0x14] sm:$0xf] }
  0xeb   :  { %v3157_v29 = vor.u32 %v3660_v19, %v3154_v20  ;;  %v3698_v20 = vld [vmem:[#allocation5 + $0x144] sm:$0xf] }
  0xec   :  { %2072 = vmatpush.bf16.msra.mxu1 %v3209_v36  ;;  %v1404_v0 = vpop.f32.mrf.mxu0  ;;  %v1417_v11 = vpop.f32.mrf.mxu1 }
  0xed   :  { %v1405_v1 = vadd.f32 %v1404_v0, %v1392_v58  ;;  %2079 = vmatpush.bf16.msra.mxu2 %v3321_v57  ;;  %v264_v57 = vperm.slane %v3952_v6, 2 }
  0xee   :  { %2059 = vmatpush.bf16.msra.mxu3 %v3145_v28 }
  0xef   :  { %v1418_v15 = vadd.f32 %v1417_v11, %v1405_v1  ;;  %v3702_v11 = vld [vmem:[#allocation5 + $0x164] sm:$0xf] }
  0xf0   :  { %2117 = vmatpush.bf16.msrb.mxu1 %v3269_v38  ;;  %v3325_v13 = vor.u32 %v3702_v11, %v3322_v12 }
  0xf1   :  { %2060 = vmatmul.bf16.vlgmr.msra.gmra.mxu3 %v3970_v46  ;;  %2080 = vmatpush.bf16.msra.mxu2 %v3313_v30 }
  0xf2   :  { %2104 = vmatpush.bf16.msrb.mxu3 %v3205_v33  ;;  %v3146_v33 = vld [vmem:[#allocation5 + $0x8] sm:$0xf0] }
  0xf3   :  { %v3149_v40 = vor.u32 %v3658_v32, %v3146_v33  ;;  %v3694_v33 = vld [vmem:[#allocation5 + $0x124] sm:$0xf] }
  0xf4   :  { %2118 = vmatpush.bf16.msrb.mxu1 %v3261_v50  ;;  %v1430_v17 = vpop.f32.mrf.mxu3  ;;  %v1406_v23 = vpop.f32.mrf.mxu0  ;;  %v3296_v50 = vld [vmem:[#allocation5 + $0x130] sm:$0xf] }
  0xf5   :  { %v1431_v27 = vadd.f32 %v1430_v17, %v1418_v15  ;;  %v1419_v36 = vpop.f32.mrf.mxu1  ;;  %2081 = vmatpush.bf16.msra.mxu2 %v3305_v51  ;;  %v3314_v15 = vld [vmem:[#allocation5 + $0x158] sm:$0xf0]  ;;  %v3690_v51 = vld [vmem:[#allocation5 + $0x104] sm:$0xf] }
  0xf6   :  { %2105 = vmatpush.bf16.msrb.mxu3 %v3197_v47 }
  0xf8   :  { %2119 = vmatpush.bf16.msrb.mxu1 %v3253_v56  ;;  %v1443_v28 = vpop.f32.mrf.mxu2  ;;  %v3695_v56 = vld [vmem:[#allocation5 + $0x124] sm:$0xf0] }
  0xf9   :  { %v1444_v38 = vadd.f32 %v1443_v28, %v1431_v27  ;;  %v3289_v59 = vor.u32 %v3695_v56, %v3288_v55  ;;  %v3301_v27 = vor.u32 %v3696_v25, %v3298_v26  ;;  %v3392_v28 = vld [vmem:[#allocation5 + $0x1f0] sm:$0xf]  ;;  %v3368_v55 = vld [vmem:[#allocation5 + $0x1c0] sm:$0xf]  ;;  %v3715_v56 = vld [vmem:[#allocation5 + $0x1c4] sm:$0xf0] }
  0xfa   :  { %2106 = vmatpush.bf16.msrb.mxu3 %v3189_v54  ;;  %v3297_v54 = vor.u32 %v3697_v52, %v3296_v50  ;;  %v3377_v50 = vor.u32 %v3717_v49, %v3376_v31  ;;  %v3274_v52 = vld [vmem:[#allocation5 + $0x108] sm:$0xf0]  ;;  %v3716_v25 = vld [vmem:[#allocation5 + $0x1d4] sm:$0xf]  ;;  %v3378_v26 = vld [vmem:[#allocation5 + $0x1d8] sm:$0xf0] }
  0xfb   :  { %v3346_v49 = vld [vmem:[#allocation5 + $0x198] sm:$0xf0] }
  0xfc   :  { %2120 = vmatpush.bf16.msrb.mxu1 %v3245_v63  ;;  %v1432_v41 = vpop.f32.mrf.mxu3  ;;  %v1456_v44 = vpop.f32.mrf.mxu0  ;;  %2082 = vmatpush.bf16.msra.mxu2 %v3297_v54  ;;  %v3693_v63 = vld [vmem:[#allocation5 + $0x114] sm:$0xf0] }
  0xfd   :  { %v1457_v45 = vadd.f32 %v1456_v44, %v1444_v38  ;;  %v3281_v0 = vor.u32 %v3693_v63, %v3280_v34  ;;  %v3692_v44 = vld [vmem:[#allocation5 + $0x114] sm:$0xf] }
  0xfe   :  { %2107 = vmatpush.bf16.msrb.mxu3 %v3181_v61 }
  0xff   :  { %v1643_v53 = vmul.f32 0.5, %v1457_v45  ;;  %v3282_v45 = vld [vmem:[#allocation5 + $0x118] sm:$0xf0] }
 0x100   :  { %2121 = vmatpush.bf16.msrb.mxu1 %v3237_v8  ;;  %v1445_v47 = vpop.f32.mrf.mxu2  ;;  %2083 = vmatpush.bf16.msra.mxu2 %v3289_v59  ;;  %v3369_v59 = vor.u32 %v3715_v56, %v3368_v55  ;;  %v3338_v55 = vld [vmem:[#allocation5 + $0x188] sm:$0xf0] }
 0x101   :  { %3748 = vtanh.f32 %v1643_v53  ;;  %v3285_v47 = vor.u32 %v3692_v44, %v3282_v45  ;;  %v3710_v44 = vld [vmem:[#allocation5 + $0x1a4] sm:$0xf]  ;;  %v3354_v45 = vld [vmem:[#allocation5 + $0x1a8] sm:$0xf0] }
 0x102   :  { %2108 = vmatpush.bf16.msrb.mxu3 %v3173_v4 }
 0x104   :  { %2122 = vmatpush.bf16.msrb.mxu1 %v3229_v21  ;;  %v1458_v60 = vpop.f32.mrf.mxu0  ;;  %2084 = vmatpush.bf16.msra.mxu2 %v3281_v0  ;;  %v3306_v21 = vld [vmem:[#allocation5 + $0x148] sm:$0xf0]  ;;  %v3360_v0 = vld [vmem:[#allocation5 + $0x1b0] sm:$0xf] }
 0x105   :  { %v3309_v22 = vor.u32 %v3698_v20, %v3306_v21  ;;  %v3277_v60 = vor.u32 %v3690_v51, %v3274_v52  ;;  %v3718_v21 = vld [vmem:[#allocation5 + $0x1e4] sm:$0xf] }
 0x106   :  { %2109 = vmatpush.bf16.msrb.mxu3 %v3165_v16  ;;  %v3317_v16 = vor.u32 %v3700_v14, %v3314_v15  ;;  %v3707_v14 = vld [vmem:[#allocation5 + $0x184] sm:$0xf0] }
 0x107   :  { %v3749_v58 = vpop.eup %3748 }
 0x108   :  { %2123 = vmatpush.bf16.msrb.mxu1 %v3221_v35  ;;  %v1651_v37 = vmul.f32 0.5, %v3749_v58  ;;  %v3290_v35 = vld [vmem:[#allocation5 + $0x128] sm:$0xf0] }
 0x109   :  { %v3293_v36 = vor.u32 %v3694_v33, %v3290_v35 }
 0x10a   :  { %2110 = vmatpush.bf16.msrb.mxu3 %v3157_v29  ;;  %v1655_v62 = vadd.f32 0.5, %v1651_v37  ;;  %v3721_v29 = vld [vmem:[#allocation5 + $0x1f4] sm:$0xf0] }
 0x10b   :  { %v3393_v30 = vor.u32 %v3721_v29, %v3392_v28  ;;  %v265_v28 = vperm.slane %v3952_v6, 3  ;;  %v3714_v29 = vld [vmem:[#allocation5 + $0x1c4] sm:$0xf]  ;;  %v3708_v6 = vld [vmem:[#allocation5 + $0x194] sm:$0xf] }
 0x10c   :  { %2124 = vmatpush.bf16.msrb.mxu1 %v3213_v43  ;;  %v1469_v61 = vpop.f32.mrf.mxu1  ;;  %v1659_v1 = vpack.c.bf16 %v1655_v62, %v1655_v62 }
 0x10d   :  { %v1470_v24 = vadd.f32 %v1469_v61, %v264_v57  ;;  %2091 = vmatpush.bf16.msra.mxu0 %v3393_v30  ;;  %v3720_v57 = vld [vmem:[#allocation5 + $0x1f4] sm:$0xf]  ;;  %v3370_v30 = vld [vmem:[#allocation5 + $0x1c8] sm:$0xf0] }
 0x10e   :  { %2111 = vmatpush.bf16.msrb.mxu3 %v3149_v40  ;;  %2073 = vmatmul.bf16.vlgmr.msra.gmra.mxu1 %v1659_v1  ;;  %v3385_v40 = vor.u32 %v3719_v18, %v3384_v48  ;;  %v3373_v33 = vor.u32 %v3714_v29, %v3370_v30  ;;  %v3722_v29 = vld [vmem:[%s4038_s5] sm:$0xff] }
 0x10f   :  { %v3734_v30 = vld [vmem:[%s4038_s5 + $0x60] sm:$0xff] }
 0x110   :  { %v1495_v2 = vpop.f32.mrf.mxu0 }
 0x111   :  { %2112 = vmatmul.bf16.vlgmr.msrb.gmra.mxu3 %v3970_v46  ;;  %v3272_v46 = vld [vmem:[#allocation5 + $0x100] sm:$0xf]  ;;  %2092 = vmatpush.bf16.msra.mxu0 %v3385_v40  ;;  %v3362_v40 = vld [vmem:[#allocation5 + $0x1b8] sm:$0xf0] }
 0x112   :  { %v3273_v4 = vor.u32 %v3691_v3, %v3272_v46  ;;  %v3352_v3 = vld [vmem:[#allocation5 + $0x1a0] sm:$0xf] }
 0x114   :  { %v1471_v8 = vpop.f32.mrf.mxu1  ;;  %2085 = vmatpush.bf16.msra.mxu2 %v3273_v4  ;;  %v1482_v10 = vpop.f32.mrf.mxu3  ;;  %v3711_v4 = vld [vmem:[#allocation5 + $0x1a4] sm:$0xf0] }
 0x115   :  { %v1483_v32 = vadd.f32 %v1482_v10, %v1470_v24  ;;  %2093 = vmatpush.bf16.msra.mxu0 %v3377_v50  ;;  %v3709_v8 = vld [vmem:[#allocation5 + $0x194] sm:$0xf0] }
 0x116   :  { %v3345_v11 = vor.u32 %v3709_v8, %v3344_v42 }
 0x117   :  { %v1496_v41 = vadd.f32 %v1495_v2, %v1483_v32 }
 0x118   :  { %v1508_v9 = vpop.f32.mrf.mxu2  ;;  %2130 = vmatpush.bf16.msrb.mxu2 %v3333_v7  ;;  %v1497_v39 = vpop.f32.mrf.mxu0  ;;  %v3353_v7 = vor.u32 %v3711_v4, %v3352_v3  ;;  %v1726_v4 = vld [vmem:[%s4037_s4] sm:$0x3] }
 0x119   :  { %v1509_v53 = vadd.f32 %v1508_v9, %v1496_v41  ;;  %2094 = vmatpush.bf16.msra.mxu0 %v3369_v59  ;;  %v3336_v39 = vld [vmem:[#allocation5 + $0x180] sm:$0xf] }
 0x11c   :  { %2131 = vmatpush.bf16.msrb.mxu2 %v3325_v13  ;;  %v1484_v19 = vpop.f32.mrf.mxu3 }
 0x11e   :  { %2125 = vmatmul.bf16.vlgmr.msrb.gmra.mxu1 %v1659_v1  ;;  %v3713_v1 = vld [vmem:[#allocation5 + $0x1b4] sm:$0xf0] }
 0x11f   :  { %v3361_v2 = vor.u32 %v3713_v1, %v3360_v0 }
 0x120   :  { %v1510_v17 = vpop.f32.mrf.mxu2  ;;  %2132 = vmatpush.bf16.msrb.mxu2 %v3317_v16  ;;  %v1547_v23 = vpop.f32.mrf.mxu0  ;;  %v3337_v16 = vor.u32 %v3707_v14, %v3336_v39 }
 0x121   :  { %2095 = vmatpush.bf16.msra.mxu0 %v3361_v2  ;;  %v3394_v17 = vld [vmem:[#allocation5 + $0x1f8] sm:$0xf0] }
 0x122   :  { %v3397_v19 = vor.u32 %v3720_v57, %v3394_v17  ;;  %v3728_v57 = vld [vmem:[%s4038_s5 + $0x30] sm:$0xff]  ;;  %v3727_v17 = vld [vmem:[%s4038_s5 + $0x28] sm:$0xff] }
 0x124   :  { %2133 = vmatpush.bf16.msrb.mxu2 %v3309_v22  ;;  %v3386_v22 = vld [vmem:[#allocation5 + $0x1e8] sm:$0xf0] }
 0x125   :  { %2096 = vmatpush.bf16.msra.mxu0 %v3353_v7 }
 0x128   :  { %2134 = vmatpush.bf16.msrb.mxu2 %v3301_v27  ;;  %v1549_v38 = vpop.f32.mrf.mxu0  ;;  %v3381_v27 = vor.u32 %v3716_v25, %v3378_v26  ;;  %v3736_v25 = vld [vmem:[%s4038_s5 + $0x70] sm:$0xff] }
 0x129   :  { %2097 = vmatpush.bf16.msra.mxu0 %v3345_v11  ;;  %v3712_v38 = vld [vmem:[#allocation5 + $0x1b4] sm:$0xf] }
 0x12a   :  { %v3365_v41 = vor.u32 %v3712_v38, %v3362_v40 }
 0x12c   :  { %v1521_v43 = vpop.f32.mrf.mxu1  ;;  %2135 = vmatpush.bf16.msrb.mxu2 %v3293_v36 }
 0x12d   :  { %v1522_v54 = vadd.f32 %v1521_v43, %v1509_v53  ;;  %2098 = vmatpush.bf16.msra.mxu0 %v3337_v16  ;;  %v3729_v16 = vld [vmem:[%s4038_s5 + $0x38] sm:$0xff] }
 0x12e   :  { %2298 = vmatpush.bf16.msra.mxu3 %v3729_v16 }
 0x130   :  { %2136 = vmatpush.bf16.msrb.mxu2 %v3285_v47  ;;  %v3357_v47 = vor.u32 %v3710_v44, %v3354_v45 }
 0x131   :  { %2143 = vmatpush.bf16.msrb.mxu0 %v3397_v19 }
 0x132   :  { %2299 = vmatpush.bf16.msra.mxu3 %v3728_v57 }
 0x134   :  { %v1534_v58 = vpop.f32.mrf.mxu3  ;;  %v1523_v61 = vpop.f32.mrf.mxu1  ;;  %2137 = vmatpush.bf16.msrb.mxu2 %v3277_v60  ;;  %v3706_v60 = vld [vmem:[#allocation5 + $0x184] sm:$0xf] }
 0x135   :  { %v1535_v37 = vadd.f32 %v1534_v58, %v1522_v54  ;;  %v1573_v34 = vpop.f32.mrf.mxu0  ;;  %v3349_v54 = vor.u32 %v3708_v6, %v3346_v49  ;;  %v3341_v58 = vor.u32 %v3706_v60, %v3338_v55 }
 0x136   :  { %2300 = vmatpush.bf16.msra.mxu3 %v3727_v17 }
 0x137   :  { %v1548_v63 = vadd.f32 %v1547_v23, %v1535_v37  ;;  %v3389_v23 = vor.u32 %v3718_v21, %v3386_v22  ;;  %v3725_v22 = vld [vmem:[%s4038_s5 + $0x18] sm:$0xff] }
 0x138   :  { %v1560_v62 = vpop.f32.mrf.mxu2 }
 0x139   :  { %v1644_v46 = vmul.f32 0.5, %v1548_v63  ;;  %2144 = vmatpush.bf16.msrb.mxu0 %v3389_v23  ;;  %v1561_v35 = vadd.f32 %v1560_v62, %v265_v28  ;;  %v3737_v23 = vld [vmem:[%s4038_s5 + $0x78] sm:$0xff]  ;;  %v3735_v28 = vld [vmem:[%s4038_s5 + $0x68] sm:$0xff] }
 0x13a   :  { %2311 = vmatpush.bf16.msra.mxu1 %v3737_v23 }
 0x13b   :  { %3750 = vtanh.f32 %v1644_v46  ;;  %v1574_v43 = vadd.f32 %v1573_v34, %v1561_v35  ;;  %v3732_v35 = vld [vmem:[%s4038_s5 + $0x50] sm:$0xff] }
 0x13c   :  { %v1536_v5 = vpop.f32.mrf.mxu3 }
 0x13d   :  { %v1575_v10 = vpop.f32.mrf.mxu0  ;;  %2145 = vmatpush.bf16.msrb.mxu0 %v3381_v27  ;;  %v1728_v5 = vperm.slane %v1726_v4, 0  ;;  %v3723_v27 = vld [vmem:[%s4038_s5 + $0x8] sm:$0xff] }
 0x13e   :  { %2312 = vmatpush.bf16.msra.mxu1 %v3736_v25 }
 0x140   :  { %v1562_v9 = vpop.f32.mrf.mxu2 }
 0x141   :  { %v3751_v12 = vpop.eup %3750  ;;  %2146 = vmatpush.bf16.msrb.mxu0 %v3373_v33  ;;  %v3733_v33 = vld [vmem:[%s4038_s5 + $0x58] sm:$0xff] }
 0x142   :  { %v1652_v13 = vmul.f32 0.5, %v3751_v12  ;;  %v1729_v12 = vperm.slane %v1726_v4, 1  ;;  %2313 = vmatpush.bf16.msra.mxu1 %v3735_v28 }
 0x144   :  { %v1656_v15 = vadd.f32 0.5, %v1652_v13 }
 0x145   :  { %2147 = vmatpush.bf16.msrb.mxu0 %v3365_v41 }
 0x146   :  { %v1660_v20 = vpack.c.bf16 %v1656_v15, %v1656_v15  ;;  %2314 = vmatpush.bf16.msra.mxu1 %v3734_v30 }
 0x148   :  { %2086 = vmatmul.bf16.vlgmr.msra.gmra.mxu2 %v1660_v20 }
 0x149   :  { %2148 = vmatpush.bf16.msrb.mxu0 %v3357_v47 }
 0x14a   :  { %2315 = vmatpush.bf16.msra.mxu1 %v3733_v33 }
 0x14c   :  { %v1586_v24 = vpop.f32.mrf.mxu1 }
 0x14d   :  { %v1587_v31 = vadd.f32 %v1586_v24, %v1574_v43  ;;  %2149 = vmatpush.bf16.msrb.mxu0 %v3349_v54  ;;  %v3724_v24 = vld [vmem:[%s4038_s5 + $0x10] sm:$0xff] }
 0x14e   :  { %2316 = vmatpush.bf16.msra.mxu1 %v3732_v35 }
 0x151   :  { %2150 = vmatpush.bf16.msrb.mxu0 %v3341_v58  ;;  %v3745_v58 = vld [vmem:[%s4039_s6] ss:$0 sm:$0xff] }
 0x154   :  { %v1599_v32 = vpop.f32.mrf.mxu3  ;;  %v1588_v36 = vpop.f32.mrf.mxu1 }
 0x155   :  { %v1625_v18 = vpop.f32.mrf.mxu0  ;;  %v1600_v53 = vadd.f32 %v1599_v32, %v1587_v31  ;;  %v3731_v36 = vld [vmem:[%s4038_s5 + $0x48] sm:$0xff] }
 0x156   :  { %2317 = vmatpush.bf16.msra.mxu1 %v3731_v36 }
 0x158   :  { %v1612_v48 = vpop.f32.mrf.mxu2  ;;  %2138 = vmatmul.bf16.vlgmr.msrb.gmra.mxu2 %v1660_v20  ;;  %v3726_v20 = vld [vmem:[%s4038_s5 + $0x20] sm:$0xff] }
 0x159   :  { %v1613_v56 = vadd.f32 %v1612_v48, %v1600_v53  ;;  %2301 = vmatpush.bf16.msra.mxu3 %v3726_v20  ;;  %v3730_v48 = vld [vmem:[%s4038_s5 + $0x40] sm:$0xff] }
 0x15a   :  { %2318 = vmatpush.bf16.msra.mxu1 %v3730_v48 }
 0x15b   :  { %v1626_v59 = vadd.f32 %v1625_v18, %v1613_v56 }
 0x15c   :  { %v1601_v50 = vpop.f32.mrf.mxu3 }
 0x15d   :  { %v1627_v52 = vpop.f32.mrf.mxu0  ;;  %2302 = vmatpush.bf16.msra.mxu3 %v3725_v22 }
 0x160   :  { %v1614_v51 = vpop.f32.mrf.mxu2 }
 0x161   :  { %2303 = vmatpush.bf16.msra.mxu3 %v3724_v24 }
 0x165   :  { %2304 = vmatpush.bf16.msra.mxu3 %v3723_v27 }
 0x168   :  { %v1638_v37 = vpop.f32.mrf.mxu2 }
 0x169   :  { %v1639_v61 = vadd.f32 %v1638_v37, %v1626_v59  ;;  %2305 = vmatpush.bf16.msra.mxu3 %v3722_v29 }
 0x16b   :  { %v1645_v62 = vmul.f32 0.5, %v1639_v61 }
 0x16d   :  { %3752 = vtanh.f32 %v1645_v62 }
 0x170   :  { %v1640_v34 = vpop.f32.mrf.mxu2 }
 0x173   :  { %v3753_v63 = vpop.eup %3752 }
 0x174   :  { %v2061_v0 = vpop.f32.mrf.mxu3  ;;  %v1653_v1 = vmul.f32 0.5, %v3753_v63 }
 0x175   :  { %v2062_v7 = vadd.f32 %v2061_v0, %v1728_v5 }
 0x176   :  { %v1657_v2 = vadd.f32 0.5, %v1653_v1 }
 0x178   :  { %v1661_v46 = vpack.c.bf16 %v1657_v2, %v1657_v2 }
 0x17a   :  { %2099 = vmatmul.bf16.vlgmr.msra.gmra.mxu0 %v1661_v46 }
 0x17c   :  { %v2063_v3 = vpop.f32.mrf.mxu3 }
 0x18a   :  { %2151 = vmatmul.bf16.vlgmr.msrb.gmra.mxu0 %v1661_v46 }
 0x18b   :  { %v2074_v8 = vpop.f32.mrf.mxu1 }
 0x18c   :  { %v2075_v9 = vadd.f32 %v2074_v8, %v2062_v7 }
 0x193   :  { %v2076_v11 = vpop.f32.mrf.mxu1 }
 0x194   :  { %v2113_v42 = vpop.f32.mrf.mxu3 }
 0x195   :  { %v2114_v13 = vadd.f32 %v2113_v42, %v1729_v12 }
 0x19b   :  { %v2126_v39 = vpop.f32.mrf.mxu1 }
 0x19c   :  { %v2115_v10 = vpop.f32.mrf.mxu3  ;;  %v2127_v14 = vadd.f32 %v2126_v39, %v2114_v13 }
 0x1a3   :  { %v2128_v15 = vpop.f32.mrf.mxu1 }
 0x1cb   :  { %v2087_v19 = vpop.f32.mrf.mxu2 }
 0x1cc   :  { %v2088_v18 = vadd.f32 %v2087_v19, %v2075_v9 }
 0x1d3   :  { %v2089_v21 = vpop.f32.mrf.mxu2 }
 0x1db   :  { %v2139_v26 = vpop.f32.mrf.mxu2 }
 0x1dc   :  { %v2140_v31 = vadd.f32 %v2139_v26, %v2127_v14 }
 0x1e3   :  { %v2141_v32 = vpop.f32.mrf.mxu2 }
 0x1f7   :  { %v2100_v38 = vpop.f32.mrf.mxu0 }
 0x1f8   :  { %v2101_v40 = vadd.f32 %v2100_v38, %v2088_v18 }
 0x1fa   :  { %v2156_v41 = vmul.f32 0.5, %v2101_v40 }
 0x1fc   :  { %3754 = vtanh.f32 %v2156_v41 }
 0x1ff   :  { %v2102_v43 = vpop.f32.mrf.mxu0 }
 0x202   :  { %v3755_v44 = vpop.eup %3754 }
 0x203   :  { %v2160_v45 = vmul.f32 0.5, %v3755_v44 }
 0x205   :  { %v2162_v47 = vadd.f32 0.5, %v2160_v45 }
 0x207   :  { %v2164_v6 = vpack.c.bf16 %v2162_v47, %v2162_v47  ;;  %v2152_v49 = vpop.f32.mrf.mxu0 }
 0x208   :  { %v2153_v50 = vadd.f32 %v2152_v49, %v2140_v31 }
 0x209   :  { %2306 = vmatmul.bf16.vlgmr.msra.gmra.mxu3 %v2164_v6 }
 0x20a   :  { %v2157_v53 = vmul.f32 0.5, %v2153_v50 }
 0x20c   :  { %3756 = vtanh.f32 %v2157_v53 }
 0x20f   :  { %v2154_v51 = vpop.f32.mrf.mxu0 }
 0x212   :  { %v3757_v52 = vpop.eup %3756 }
 0x213   :  { %v2161_v54 = vmul.f32 0.5, %v3757_v52 }
 0x215   :  { %v2163_v60 = vadd.f32 0.5, %v2161_v54 }
 0x217   :  { %v2165_v55 = vpack.c.bf16 %v2163_v60, %v2163_v60 }
 0x219   :  { %2319 = vmatmul.bf16.vlgmr.msra.gmra.mxu1 %v2165_v55 }
 0x28c   :  { %v2307_v56 = vpop.f32.mrf.mxu3 }
 0x28d   :  { %v2308_v37 = vadd.f32 %v3745_v58, %v2307_v56 }
 0x294   :  { %v2309_v59 = vpop.f32.mrf.mxu3 }
 0x296   :  { %v2320_v61 = vpop.f32.mrf.mxu1 }
 0x297   :  { %v2321_v62 = vadd.f32 %v2320_v61, %v2308_v37 }
 0x299   :  { %2324 = vmax.xlane.f32.xlu0 %v2321_v62 }
 0x29e   :  { %v2322_v34 = vpop.f32.mrf.mxu1 }
 0x30c   :  { %v2325_v63 = vpop.xlane.xlu0 %2324 }
 0x30d   :  { %v2326_v0 = vsub.f32 %v2321_v62, %v2325_v63 }
 0x30f   :  { %v2327_v1 = vmul.f32 1.442695, %v2326_v0 }
 0x311   :  { %3758 = vpow2.f32 %v2327_v1 }
 0x317   :  { %v3759_v2 = vpop.eup %3758 }
 0x318   :  { %2329 = vadd.xlane.f32.xlu0 %v3759_v2 }
 0x38b   :  { %v2330_v46 = vpop.xlane.xlu0 %2329 }
 0x38c   :  { %3760 = vlog2.f32 %v2330_v46 }
 0x392   :  { %v3761_v3 = vpop.eup %3760 }
 0x393   :  { %v2332_v4 = vmul.f32 0.6931472, %v3761_v3 }
 0x395   :  { %v2333_v42 = vsub.f32 %v2326_v0, %v2332_v4 }
 0x397   :  { %v2334_v5 = vpack.c.bf16 %v2333_v42, %v2333_v42 }
 0x399   :  { %2335 = vst [vmem:[#allocation7] sm:$0xf] %v2334_v5 }
 0x39a   :  { %2346 = dma.vmem_to_hbm [thread:$0]  %s2342_s28, 64, %s2344_s30, [#allocation4]  }
 0x39b   :  { %3838 = dma.done.wait [#allocation4], 64  }
 0x39c   :  { %3839 = vsyncadd [#allocation4], 4294967232 }
 0x39d   :  { %2351 = vsyncpa [#allocation3], 1 }
 0x39e   :  { %2352 = vsyncpa [#allocation6], 1 }
 0x39f   :  { %2353 = vsyncpa [#allocation4], 1 }

</bundles_post_ra>
